<compile_context>
chip_gen: v6e
topology: v6e:2x2x1
jax: 0.10.0
libtpu: 0.0.40
codegen_flags: <defaults>
</compile_context>

<pallas_src>
import functools

import jax
import jax.numpy as jnp
from jax import lax
from jax.experimental import pallas as pl
from jax.experimental.pallas import tpu as pltpu

# ------------------------- synthetic config --------------------------------
D_MODEL = 32
EMB_DIM = 16
VOCAB = 32
N_EXTRA = 4          # extra (OOV) vocab slots, i.e. extra_zeros width
B = 2
L = 8                # encoder seq_len
V_EXT = VOCAB + N_EXTRA
B_PAD = 8            # pad batch to a full f32 sublane group (vreg = 8 x 128)
SLAB_W = 128         # lane-dense packed output width (one vreg wide)
# config.do_coverage = True, config.pointer_gen = True

# packed-output slab layout (lane offsets)
_CTX0 = 0                           # ctx_t        [0, 32)
_ATT0 = _CTX0 + D_MODEL             # attn_dist    [32, 40)
_COV0 = _ATT0 + L                   # coverage     [40, 48)
_PGN0 = _COV0 + L                   # p_gen        [48, 49)
_FIN0 = _PGN0 + 1                   # final_dist   [49, 85)
_PAD_W = SLAB_W - (_FIN0 + V_EXT)   # zero pad     [85, 128)

_VMEM = pl.BlockSpec(memory_space=pltpu.MemorySpace.VMEM)


# ------------------------- fused kernel -------------------------------------
def _fused_kernel(s_t_ref, enc_out_ref, enc_feat_ref, mask_ref, cov_ref,
                  ctx_in_ref, x_emb_ref, ext_idx_ref,
                  wd_ref, bd_ref, wc_ref, v_ref,
                  wx_c_ref, wx_e_ref, bx_ref,
                  wp_c_ref, wp_s_ref, wp_x_ref, bp_ref,
                  w12_s_ref, w12_c_ref, b12_ref,
                  out_ref):
    s_t = s_t_ref[...]            # (Bp, D)
    enc_out = enc_out_ref[...]    # (Bp, L, D)
    enc_feat = enc_feat_ref[...]  # (Bp, L, D) == Wh * h_i, precomputed
    mask = mask_ref[...]          # (Bp, L)
    cov = cov_ref[...]            # (Bp, L)

    # ---------------- PointerAttention ----------------
    dec_fea = jnp.dot(s_t, wd_ref[...],
                      preferred_element_type=jnp.float32) + bd_ref[...]
    # encoder_feature + dec_fea (broadcast) + coverage feature (Linear(1, D))
    att = enc_feat + dec_fea[:, None, :] + cov[:, :, None] * wc_ref[...][None, :, :]
    e = jnp.tanh(att)
    scores = jnp.sum(e * v_ref[...][None, :, :], axis=-1)        # (Bp, L)

    # softmax -> *mask -> renormalize  ==  exp*mask / sum(exp*mask)
    m = jnp.max(scores, axis=1, keepdims=True)
    ex = jnp.exp(scores - m) * mask
    attn = ex * pl.reciprocal(jnp.sum(ex, axis=1, keepdims=True), approx=True)

    ctx_t = jnp.sum(attn[:, :, None] * enc_out, axis=1)          # (Bp, D)
    cov_next = cov + attn

    # ---------------- output head ----------------
    ctx_in = ctx_in_ref[...]      # (Bp, D)  previous context_v (input arg)
    x_emb = x_emb_ref[...]        # (1, E)   gathered embedding row

    # x = x_context(cat(context_v, x_emb)) as split matmuls (no lane concat)
    x = (jnp.dot(ctx_in, wx_c_ref[...], preferred_element_type=jnp.float32)
         + jnp.dot(x_emb, wx_e_ref[...], preferred_element_type=jnp.float32)
         + bx_ref[...])                                          # (Bp, E)

    # p_gen = sigmoid(p_gen_linear(cat(ctx_t, s_t, x))) via split VPU dot-reduces
    pg_logit = (jnp.sum(ctx_t * wp_c_ref[...], axis=1, keepdims=True)
                + jnp.sum(s_t * wp_s_ref[...], axis=1, keepdims=True)
                + jnp.sum(x * wp_x_ref[...], axis=1, keepdims=True)
                + bp_ref[...])
    p_gen = jax.nn.sigmoid(pg_logit)                             # (Bp, 1)

    # out2(dropout(out1(cat(s_t, ctx_t)))) with out1/out2 folded into one
    # matmul (dropout is identity in eval).  W12/b12 columns are padded to the
    # extended vocab (zero weight, -1e30 bias) so softmax emits exact zeros in
    # the OOV slots == torch.cat([vocab_dist_, extra_zeros], 1).
    logits = (jnp.dot(s_t, w12_s_ref[...], preferred_element_type=jnp.float32)
              + jnp.dot(ctx_t, w12_c_ref[...], preferred_element_type=jnp.float32)
              + b12_ref[...])                                    # (Bp, V_EXT)
    mv = jnp.max(logits, axis=1, keepdims=True)
    exv = jnp.exp(logits - mv)
    vocab_dist = exv * pl.reciprocal(jnp.sum(exv, axis=1, keepdims=True),
                                     approx=True)                # (Bp, V_EXT)

    # pointer-generator mixing + scatter_add via one-hot reduce
    attn_dist_ = (1.0 - p_gen) * attn                            # (Bp, L)
    idx = ext_idx_ref[...]                                       # (Bp, L) int32
    iota = lax.broadcasted_iota(jnp.int32, (B_PAD, L, V_EXT), 2)
    one_hot = (idx[:, :, None] == iota).astype(jnp.float32)
    scattered = jnp.sum(attn_dist_[:, :, None] * one_hot, axis=1)  # (Bp, V_EXT)
    final = p_gen * vocab_dist + scattered                       # (Bp, V_EXT)

    # single lane-dense (Bp, 128) store — exactly one f32 vreg, unmasked vst
    slab = jnp.concatenate(
        [ctx_t, attn, cov_next, p_gen, final,
         jnp.zeros((B_PAD, _PAD_W), jnp.float32)], axis=1)
    out_ref[...] = slab


# ------------------------- wrapper -------------------------------------------
def _pad_rows(x, value=0.0):
    """Pad the leading (batch) dim up to B_PAD."""
    pad = B_PAD - x.shape[0]
    if pad <= 0:
        return x
    fill = jnp.full((pad,) + x.shape[1:], value, x.dtype)
    return jnp.concatenate([x, fill], axis=0)


@jax.jit
def pointer_decoder_forward(d_inp, d_len, s_t, enc_output, enc_feature,
                            look_ahead_mask, enc_mask, extra_zeros, context_v,
                            enc_batch_extend_vocab, coverage, step, folded):
    """Mirrors PointerDecoder.forward in eval mode with step > 0."""
    del d_inp, look_ahead_mask, extra_zeros, step  # extra_zeros width is static

    # Spec literally indexes the embedding table with d_len (the decode length),
    # not the previous token id — kept verbatim from the PyTorch source.
    x_emb_row = lax.dynamic_slice_in_dim(folded["word_embedding"], d_len, 1,
                                         axis=0)                 # (1, E)

    # TODO(synk): the `Decoder` transformer stack is not defined in the provided
    # source; the decoder's last-timestep hidden state is taken from the input
    # s_t instead of running a full transformer decoder here.
    s_t_dec = s_t

    slab = pl.pallas_call(
        _fused_kernel,
        out_shape=jax.ShapeDtypeStruct((B_PAD, SLAB_W), jnp.float32),
        in_specs=[_VMEM] * 22,
        out_specs=_VMEM,
        # NOTE: on v7x a grid over a batched decode axis + dimension_semantics=
        # ("parallel",) would engage the second TensorCore; at B=2 / L=8 the
        # single-invocation form is launch-overhead optimal.
    )(
        _pad_rows(s_t_dec), _pad_rows(enc_output), _pad_rows(enc_feature),
        _pad_rows(enc_mask, 1.0),   # padded rows get mask=1 -> no 0/0 renorm
        _pad_rows(coverage), _pad_rows(context_v), x_emb_row,
        _pad_rows(enc_batch_extend_vocab),
        folded["wd_t"], folded["bd"], folded["wc"], folded["v"],
        folded["wx_c"], folded["wx_e"], folded["bx"],
        folded["wp_c"], folded["wp_s"], folded["wp_x"], folded["bp"],
        folded["w12_s"], folded["w12_c"], folded["b12"],
    )

    slab = slab[:B]
    ctx_t = slab[:, _CTX0:_CTX0 + D_MODEL]
    attn_dist = slab[:, _ATT0:_ATT0 + L]
    coverage_next = slab[:, _COV0:_COV0 + L]
    p_gen = slab[:, _PGN0:_PGN0 + 1]
    final_dist = slab[:, _FIN0:_FIN0 + V_EXT]
    return final_dist, s_t_dec, ctx_t, attn_dist, p_gen, coverage_next


# ------------------------- params --------------------------------------------
def init_params(key):
    ks = jax.random.split(key, 10)
    sc = 0.05
    return dict(
        # PointerAttention
        wd_t=(jax.random.normal(ks[0], (D_MODEL, D_MODEL)) * sc).astype(jnp.float32),
        bd=(jax.random.normal(ks[1], (1, D_MODEL)) * sc).astype(jnp.float32),
        wc=(jax.random.normal(ks[2], (1, D_MODEL)) * sc).astype(jnp.float32),  # Linear(1, D, bias=False)
        v=(jax.random.normal(ks[3], (1, D_MODEL)) * sc).astype(jnp.float32),   # Linear(D, 1, bias=False)
        # x_context : Linear(D + E, E)
        wx_t=(jax.random.normal(ks[4], (D_MODEL + EMB_DIM, EMB_DIM)) * sc).astype(jnp.float32),
        bx=(jax.random.normal(ks[5], (1, EMB_DIM)) * sc).astype(jnp.float32),
        # p_gen_linear : Linear(2D + E, 1)
        wp=(jax.random.normal(ks[6], (1, 2 * D_MODEL + EMB_DIM)) * sc).astype(jnp.float32),
        bp=jnp.zeros((1, 1), jnp.float32),
        # out1 / out2 : normal_ weight, zeros bias
        w1_t=jax.random.normal(ks[7], (2 * D_MODEL, D_MODEL)).astype(jnp.float32),
        b1=jnp.zeros((1, D_MODEL), jnp.float32),
        w2_t=jax.random.normal(ks[8], (D_MODEL, VOCAB)).astype(jnp.float32),
        b2=jnp.zeros((1, VOCAB), jnp.float32),
        # decoder.embedding.word_embedding
        word_embedding=(jax.random.normal(ks[9], (VOCAB, EMB_DIM)) * sc).astype(jnp.float32),
    )


def fold_params(p):
    """Precompute folded / split weights consumed by the fused kernel."""
    d = D_MODEL
    w12 = p["w1_t"] @ p["w2_t"]                       # (2D, V)  out2(out1(.)) folded
    b12 = p["b1"] @ p["w2_t"] + p["b2"]               # (1, V)
    w12_ext = jnp.concatenate([w12, jnp.zeros((2 * d, N_EXTRA), jnp.float32)], 1)
    b12_ext = jnp.concatenate([b12, jnp.full((1, N_EXTRA), -1e30, jnp.float32)], 1)
    return dict(
        wd_t=p["wd_t"], bd=p["bd"], wc=p["wc"], v=p["v"],
        wx_c=p["wx_t"][:d], wx_e=p["wx_t"][d:], bx=p["bx"],
        wp_c=p["wp"][:, :d], wp_s=p["wp"][:, d:2 * d], wp_x=p["wp"][:, 2 * d:],
        bp=p["bp"],
        w12_s=w12_ext[:d], w12_c=w12_ext[d:], b12=b12_ext,
        word_embedding=p["word_embedding"],
    )


# ------------------------- pure-JAX reference --------------------------------
def reference_forward(p, d_len, s_t, enc_output, enc_feature, enc_mask,
                      context_v, ext_idx, coverage):
    """Unfolded, unfused reference mirroring the PyTorch math exactly."""
    x_emb_t = jnp.broadcast_to(p["word_embedding"][d_len], (B, EMB_DIM))
    dec_fea = s_t @ p["wd_t"] + p["bd"]
    att = enc_feature + dec_fea[:, None, :] + coverage[:, :, None] * p["wc"][None]
    e = jnp.tanh(att)
    scores = jnp.sum(e * p["v"][None], axis=-1)
    attn_ = jax.nn.softmax(scores, axis=1) * enc_mask
    attn = attn_ / jnp.sum(attn_, axis=1, keepdims=True)
    ctx_t = jnp.einsum("bl,bld->bd", attn, enc_output)
    cov_next = coverage + attn

    x = jnp.concatenate([context_v, x_emb_t], 1) @ p["wx_t"] + p["bx"]
    pg_in = jnp.concatenate([ctx_t, s_t, x], 1)
    p_gen = jax.nn.sigmoid(jnp.sum(pg_in * p["wp"], axis=1, keepdims=True) + p["bp"])
    out = jnp.concatenate([s_t, ctx_t], 1) @ p["w1_t"] + p["b1"]
    logits = out @ p["w2_t"] + p["b2"]
    vocab = jax.nn.softmax(logits, axis=1)
    vocab_ext = jnp.concatenate([p_gen * vocab,
                                 jnp.zeros((B, N_EXTRA), jnp.float32)], 1)
    one_hot = jax.nn.one_hot(ext_idx, V_EXT, dtype=jnp.float32)
    final = vocab_ext + jnp.einsum("bl,blv->bv", (1.0 - p_gen) * attn, one_hot)
    return final, ctx_t, attn, p_gen, cov_next


# ------------------------- main ----------------------------------------------
if __name__ == "__main__":
    key = jax.random.PRNGKey(0)
    kp, k1, k2, k3, k4, k5 = jax.random.split(key, 6)
    params = init_params(kp)
    folded = fold_params(params)

    d_len = 3
    max_dec_len = 6
    d_inp = jax.random.randint(k5, (B, max_dec_len), 0, VOCAB).astype(jnp.int32)
    s_t = jax.random.normal(k1, (B, D_MODEL), jnp.float32)
    enc_output = jax.random.normal(k2, (B, L, D_MODEL), jnp.float32)
    enc_feature = jax.random.normal(k3, (B, L, D_MODEL), jnp.float32)
    look_ahead_mask = jnp.zeros((B, 1, d_len + 1, d_len + 1), jnp.float32)
    enc_mask = jnp.ones((B, L), jnp.float32).at[1, 6:].set(0.0)
    extra_zeros = jnp.zeros((B, N_EXTRA), jnp.float32)
    context_v = jnp.zeros((B, D_MODEL), jnp.float32)
    enc_batch_extend_vocab = jax.random.randint(k4, (B, L), 0, V_EXT).astype(jnp.int32)
    coverage = jnp.zeros((B, L), jnp.float32)
    step = 1

    outs = pointer_decoder_forward(
        d_inp, d_len, s_t, enc_output, enc_feature, look_ahead_mask, enc_mask,
        extra_zeros, context_v, enc_batch_extend_vocab, coverage, step, folded)
    outs = jax.block_until_ready(outs)

    final_dist, s_t_out, ctx_t, attn_dist, p_gen, cov = outs
    assert final_dist.shape == (B, V_EXT)
    assert ctx_t.shape == (B, D_MODEL)
    assert attn_dist.shape == (B, L)
    assert p_gen.shape == (B, 1)
    assert cov.shape == (B, L)

    # final_dist rows sum to 1 (tolerance covers the approx EUP reciprocal)
    assert jnp.allclose(jnp.sum(final_dist, axis=1), 1.0, atol=2e-3)

    # compare against the unfolded pure-JAX reference
    ref_final, ref_ctx, ref_attn, ref_pg, ref_cov = reference_forward(
        params, d_len, s_t, enc_output, enc_feature, enc_mask, context_v,
        enc_batch_extend_vocab, coverage)
    assert jnp.allclose(final_dist, ref_final, atol=2e-3, rtol=2e-3)
    assert jnp.allclose(ctx_t, ref_ctx, atol=2e-3, rtol=2e-3)
    assert jnp.allclose(attn_dist, ref_attn, atol=2e-3, rtol=2e-3)
    assert jnp.allclose(p_gen, ref_pg, atol=2e-3, rtol=2e-3)
    assert jnp.allclose(cov, ref_cov, atol=2e-3, rtol=2e-3)

    print("KERNEL_OK")
</pallas_src>

<mosaic_0001>
module attributes {stable_mosaic.version = 11 : i64} {
  func.func @_fused_kernel(%arg0: memref<8x32xf32, #tpu.memory_space<vmem>>, %arg1: memref<8x8x32xf32, #tpu.memory_space<vmem>>, %arg2: memref<8x8x32xf32, #tpu.memory_space<vmem>>, %arg3: memref<8x8xf32, #tpu.memory_space<vmem>>, %arg4: memref<8x8xf32, #tpu.memory_space<vmem>>, %arg5: memref<8x32xf32, #tpu.memory_space<vmem>>, %arg6: memref<1x16xf32, #tpu.memory_space<vmem>>, %arg7: memref<8x8xi32, #tpu.memory_space<vmem>>, %arg8: memref<32x32xf32, #tpu.memory_space<vmem>>, %arg9: memref<1x32xf32, #tpu.memory_space<vmem>>, %arg10: memref<1x32xf32, #tpu.memory_space<vmem>>, %arg11: memref<1x32xf32, #tpu.memory_space<vmem>>, %arg12: memref<32x16xf32, #tpu.memory_space<vmem>>, %arg13: memref<16x16xf32, #tpu.memory_space<vmem>>, %arg14: memref<1x16xf32, #tpu.memory_space<vmem>>, %arg15: memref<1x32xf32, #tpu.memory_space<vmem>>, %arg16: memref<1x32xf32, #tpu.memory_space<vmem>>, %arg17: memref<1x16xf32, #tpu.memory_space<vmem>>, %arg18: memref<1x1xf32, #tpu.memory_space<vmem>>, %arg19: memref<32x36xf32, #tpu.memory_space<vmem>>, %arg20: memref<32x36xf32, #tpu.memory_space<vmem>>, %arg21: memref<1x36xf32, #tpu.memory_space<vmem>>, %arg22: memref<8x128xf32, #tpu.memory_space<vmem>>) attributes {dimension_semantics = [], scalar_prefetch = 0 : i64, scratch_operands = 0 : i64, tpu.core_type = #tpu.core_type<tc>} {
    %c0 = arith.constant 0 : index
    %c0_0 = arith.constant 0 : index
    %0 = vector.load %arg0[%c0, %c0_0] : memref<8x32xf32, #tpu.memory_space<vmem>>, vector<8x32xf32>
    %c0_1 = arith.constant 0 : index
    %c0_2 = arith.constant 0 : index
    %c0_3 = arith.constant 0 : index
    %1 = vector.load %arg1[%c0_1, %c0_2, %c0_3] : memref<8x8x32xf32, #tpu.memory_space<vmem>>, vector<8x8x32xf32>
    %c0_4 = arith.constant 0 : index
    %c0_5 = arith.constant 0 : index
    %c0_6 = arith.constant 0 : index
    %2 = vector.load %arg2[%c0_4, %c0_5, %c0_6] : memref<8x8x32xf32, #tpu.memory_space<vmem>>, vector<8x8x32xf32>
    %c0_7 = arith.constant 0 : index
    %c0_8 = arith.constant 0 : index
    %3 = vector.load %arg3[%c0_7, %c0_8] : memref<8x8xf32, #tpu.memory_space<vmem>>, vector<8x8xf32>
    %c0_9 = arith.constant 0 : index
    %c0_10 = arith.constant 0 : index
    %4 = vector.load %arg4[%c0_9, %c0_10] : memref<8x8xf32, #tpu.memory_space<vmem>>, vector<8x8xf32>
    %c0_11 = arith.constant 0 : index
    %c0_12 = arith.constant 0 : index
    %5 = vector.load %arg8[%c0_11, %c0_12] : memref<32x32xf32, #tpu.memory_space<vmem>>, vector<32x32xf32>
    %cst = arith.constant dense<0.000000e+00> : vector<8x32xf32>
    %6 = tpu.matmul %0, %5, %cst {dimension_numbers = #tpu.dot_dimension_numbers<[1], [0], [0], [1], [0, 0, 1, 1], [], []>} : vector<8x32xf32>, vector<32x32xf32>, vector<8x32xf32> -> vector<8x32xf32>
    %c0_13 = arith.constant 0 : index
    %c0_14 = arith.constant 0 : index
    %7 = vector.load %arg9[%c0_13, %c0_14] : memref<1x32xf32, #tpu.memory_space<vmem>>, vector<1x32xf32>
    %8 = vector.broadcast %7 : vector<1x32xf32> to vector<8x32xf32>
    %9 = arith.addf %6, %8 : vector<8x32xf32>
    %10 = vector.shape_cast %9 : vector<8x32xf32> to vector<8x1x32xf32>
    %11 = vector.broadcast %10 : vector<8x1x32xf32> to vector<8x8x32xf32>
    %12 = arith.addf %2, %11 : vector<8x8x32xf32>
    %13 = vector.shape_cast %4 : vector<8x8xf32> to vector<8x8x1xf32>
    %c0_15 = arith.constant 0 : index
    %c0_16 = arith.constant 0 : index
    %14 = vector.load %arg10[%c0_15, %c0_16] : memref<1x32xf32, #tpu.memory_space<vmem>>, vector<1x32xf32>
    %15 = vector.shape_cast %14 : vector<1x32xf32> to vector<1x1x32xf32>
    %16 = vector.broadcast %13 : vector<8x8x1xf32> to vector<8x8x32xf32>
    %17 = vector.broadcast %15 : vector<1x1x32xf32> to vector<8x8x32xf32>
    %18 = arith.mulf %16, %17 : vector<8x8x32xf32>
    %19 = arith.addf %12, %18 : vector<8x8x32xf32>
    %20 = math.tanh %19 : vector<8x8x32xf32>
    %c0_17 = arith.constant 0 : index
    %c0_18 = arith.constant 0 : index
    %21 = vector.load %arg11[%c0_17, %c0_18] : memref<1x32xf32, #tpu.memory_space<vmem>>, vector<1x32xf32>
    %22 = vector.shape_cast %21 : vector<1x32xf32> to vector<1x1x32xf32>
    %23 = vector.broadcast %22 : vector<1x1x32xf32> to vector<8x8x32xf32>
    %24 = arith.mulf %20, %23 : vector<8x8x32xf32>
    %cst_19 = arith.constant dense<0.000000e+00> : vector<8x8xf32>
    %25 = vector.multi_reduction <add>, %24, %cst_19 [2] : vector<8x8x32xf32> to vector<8x8xf32>
    %cst_20 = arith.constant dense<0xFF800000> : vector<8xf32>
    %26 = vector.multi_reduction <maximumf>, %25, %cst_20 [1] : vector<8x8xf32> to vector<8xf32>
    %27 = vector.shape_cast %26 : vector<8xf32> to vector<8x1xf32>
    %28 = vector.broadcast %27 : vector<8x1xf32> to vector<8x8xf32>
    %29 = arith.subf %25, %28 : vector<8x8xf32>
    %30 = math.exp %29 : vector<8x8xf32>
    %31 = arith.mulf %30, %3 : vector<8x8xf32>
    %cst_21 = arith.constant dense<0.000000e+00> : vector<8xf32>
    %32 = vector.multi_reduction <add>, %31, %cst_21 [1] : vector<8x8xf32> to vector<8xf32>
    %33 = vector.shape_cast %32 : vector<8xf32> to vector<8x1xf32>
    %34 = tpu.reciprocal %33 {approx = true} : vector<8x1xf32> -> vector<8x1xf32>
    %35 = vector.broadcast %34 : vector<8x1xf32> to vector<8x8xf32>
    %36 = arith.mulf %31, %35 : vector<8x8xf32>
    %37 = vector.shape_cast %36 : vector<8x8xf32> to vector<8x8x1xf32>
    %38 = vector.broadcast %37 : vector<8x8x1xf32> to vector<8x8x32xf32>
    %39 = arith.mulf %38, %1 : vector<8x8x32xf32>
    %cst_22 = arith.constant dense<0.000000e+00> : vector<8x32xf32>
    %40 = vector.multi_reduction <add>, %39, %cst_22 [1] : vector<8x8x32xf32> to vector<8x32xf32>
    %41 = arith.addf %4, %36 : vector<8x8xf32>
    %c0_23 = arith.constant 0 : index
    %c0_24 = arith.constant 0 : index
    %42 = vector.load %arg5[%c0_23, %c0_24] : memref<8x32xf32, #tpu.memory_space<vmem>>, vector<8x32xf32>
    %c0_25 = arith.constant 0 : index
    %c0_26 = arith.constant 0 : index
    %43 = vector.load %arg6[%c0_25, %c0_26] : memref<1x16xf32, #tpu.memory_space<vmem>>, vector<1x16xf32>
    %c0_27 = arith.constant 0 : index
    %c0_28 = arith.constant 0 : index
    %44 = vector.load %arg12[%c0_27, %c0_28] : memref<32x16xf32, #tpu.memory_space<vmem>>, vector<32x16xf32>
    %cst_29 = arith.constant dense<0.000000e+00> : vector<8x16xf32>
    %45 = tpu.matmul %42, %44, %cst_29 {dimension_numbers = #tpu.dot_dimension_numbers<[1], [0], [0], [1], [0, 0, 1, 1], [], []>} : vector<8x32xf32>, vector<32x16xf32>, vector<8x16xf32> -> vector<8x16xf32>
    %c0_30 = arith.constant 0 : index
    %c0_31 = arith.constant 0 : index
    %46 = vector.load %arg13[%c0_30, %c0_31] : memref<16x16xf32, #tpu.memory_space<vmem>>, vector<16x16xf32>
    %cst_32 = arith.constant dense<0.000000e+00> : vector<1x16xf32>
    %47 = tpu.matmul %43, %46, %cst_32 {dimension_numbers = #tpu.dot_dimension_numbers<[1], [0], [0], [1], [0, 0, 1, 1], [], []>} : vector<1x16xf32>, vector<16x16xf32>, vector<1x16xf32> -> vector<1x16xf32>
    %48 = vector.broadcast %47 : vector<1x16xf32> to vector<8x16xf32>
    %49 = arith.addf %45, %48 : vector<8x16xf32>
    %c0_33 = arith.constant 0 : index
    %c0_34 = arith.constant 0 : index
    %50 = vector.load %arg14[%c0_33, %c0_34] : memref<1x16xf32, #tpu.memory_space<vmem>>, vector<1x16xf32>
    %51 = vector.broadcast %50 : vector<1x16xf32> to vector<8x16xf32>
    %52 = arith.addf %49, %51 : vector<8x16xf32>
    %c0_35 = arith.constant 0 : index
    %c0_36 = arith.constant 0 : index
    %53 = vector.load %arg15[%c0_35, %c0_36] : memref<1x32xf32, #tpu.memory_space<vmem>>, vector<1x32xf32>
    %54 = vector.broadcast %53 : vector<1x32xf32> to vector<8x32xf32>
    %55 = arith.mulf %40, %54 : vector<8x32xf32>
    %cst_37 = arith.constant dense<0.000000e+00> : vector<8xf32>
    %56 = vector.multi_reduction <add>, %55, %cst_37 [1] : vector<8x32xf32> to vector<8xf32>
    %57 = vector.shape_cast %56 : vector<8xf32> to vector<8x1xf32>
    %c0_38 = arith.constant 0 : index
    %c0_39 = arith.constant 0 : index
    %58 = vector.load %arg16[%c0_38, %c0_39] : memref<1x32xf32, #tpu.memory_space<vmem>>, vector<1x32xf32>
    %59 = vector.broadcast %58 : vector<1x32xf32> to vector<8x32xf32>
    %60 = arith.mulf %0, %59 : vector<8x32xf32>
    %cst_40 = arith.constant dense<0.000000e+00> : vector<8xf32>
    %61 = vector.multi_reduction <add>, %60, %cst_40 [1] : vector<8x32xf32> to vector<8xf32>
    %62 = vector.shape_cast %61 : vector<8xf32> to vector<8x1xf32>
    %63 = arith.addf %57, %62 : vector<8x1xf32>
    %c0_41 = arith.constant 0 : index
    %c0_42 = arith.constant 0 : index
    %64 = vector.load %arg17[%c0_41, %c0_42] : memref<1x16xf32, #tpu.memory_space<vmem>>, vector<1x16xf32>
    %65 = vector.broadcast %64 : vector<1x16xf32> to vector<8x16xf32>
    %66 = arith.mulf %52, %65 : vector<8x16xf32>
    %cst_43 = arith.constant dense<0.000000e+00> : vector<8xf32>
    %67 = vector.multi_reduction <add>, %66, %cst_43 [1] : vector<8x16xf32> to vector<8xf32>
    %68 = vector.shape_cast %67 : vector<8xf32> to vector<8x1xf32>
    %69 = arith.addf %63, %68 : vector<8x1xf32>
    %c0_44 = arith.constant 0 : index
    %c0_45 = arith.constant 0 : index
    %70 = vector.load %arg18[%c0_44, %c0_45] : memref<1x1xf32, #tpu.memory_space<vmem>>, vector<1x1xf32>
    %71 = vector.broadcast %70 : vector<1x1xf32> to vector<8x1xf32>
    %72 = arith.addf %69, %71 : vector<8x1xf32>
    %73 = arith.negf %72 : vector<8x1xf32>
    %74 = math.exp %73 : vector<8x1xf32>
    %cst_46 = arith.constant 1.000000e+00 : f32
    %75 = vector.broadcast %cst_46 : f32 to vector<8x1xf32>
    %76 = arith.addf %75, %74 : vector<8x1xf32>
    %77 = arith.divf %75, %76 : vector<8x1xf32>
    %c0_47 = arith.constant 0 : index
    %c0_48 = arith.constant 0 : index
    %78 = vector.load %arg19[%c0_47, %c0_48] : memref<32x36xf32, #tpu.memory_space<vmem>>, vector<32x36xf32>
    %cst_49 = arith.constant dense<0.000000e+00> : vector<8x36xf32>
    %79 = tpu.matmul %0, %78, %cst_49 {dimension_numbers = #tpu.dot_dimension_numbers<[1], [0], [0], [1], [0, 0, 1, 1], [], []>} : vector<8x32xf32>, vector<32x36xf32>, vector<8x36xf32> -> vector<8x36xf32>
    %c0_50 = arith.constant 0 : index
    %c0_51 = arith.constant 0 : index
    %80 = vector.load %arg20[%c0_50, %c0_51] : memref<32x36xf32, #tpu.memory_space<vmem>>, vector<32x36xf32>
    %cst_52 = arith.constant dense<0.000000e+00> : vector<8x36xf32>
    %81 = tpu.matmul %40, %80, %cst_52 {dimension_numbers = #tpu.dot_dimension_numbers<[1], [0], [0], [1], [0, 0, 1, 1], [], []>} : vector<8x32xf32>, vector<32x36xf32>, vector<8x36xf32> -> vector<8x36xf32>
    %82 = arith.addf %79, %81 : vector<8x36xf32>
    %c0_53 = arith.constant 0 : index
    %c0_54 = arith.constant 0 : index
    %83 = vector.load %arg21[%c0_53, %c0_54] : memref<1x36xf32, #tpu.memory_space<vmem>>, vector<1x36xf32>
    %84 = vector.broadcast %83 : vector<1x36xf32> to vector<8x36xf32>
    %85 = arith.addf %82, %84 : vector<8x36xf32>
    %cst_55 = arith.constant dense<0xFF800000> : vector<8xf32>
    %86 = vector.multi_reduction <maximumf>, %85, %cst_55 [1] : vector<8x36xf32> to vector<8xf32>
    %87 = vector.shape_cast %86 : vector<8xf32> to vector<8x1xf32>
    %88 = vector.broadcast %87 : vector<8x1xf32> to vector<8x36xf32>
    %89 = arith.subf %85, %88 : vector<8x36xf32>
    %90 = math.exp %89 : vector<8x36xf32>
    %cst_56 = arith.constant dense<0.000000e+00> : vector<8xf32>
    %91 = vector.multi_reduction <add>, %90, %cst_56 [1] : vector<8x36xf32> to vector<8xf32>
    %92 = vector.shape_cast %91 : vector<8xf32> to vector<8x1xf32>
    %93 = tpu.reciprocal %92 {approx = true} : vector<8x1xf32> -> vector<8x1xf32>
    %94 = vector.broadcast %93 : vector<8x1xf32> to vector<8x36xf32>
    %95 = arith.mulf %90, %94 : vector<8x36xf32>
    %cst_57 = arith.constant 1.000000e+00 : f32
    %96 = vector.broadcast %cst_57 : f32 to vector<8x1xf32>
    %97 = arith.subf %96, %77 : vector<8x1xf32>
    %98 = vector.broadcast %97 : vector<8x1xf32> to vector<8x8xf32>
    %99 = arith.mulf %98, %36 : vector<8x8xf32>
    %c0_58 = arith.constant 0 : index
    %c0_59 = arith.constant 0 : index
    %100 = vector.load %arg7[%c0_58, %c0_59] : memref<8x8xi32, #tpu.memory_space<vmem>>, vector<8x8xi32>
    %101 = tpu.iota {dimensions = array<i32: 2>} : vector<8x8x36xi32>
    %102 = vector.shape_cast %100 : vector<8x8xi32> to vector<8x8x1xi32>
    %103 = vector.broadcast %102 : vector<8x8x1xi32> to vector<8x8x36xi32>
    %104 = arith.cmpi eq, %103, %101 : vector<8x8x36xi32>
    %105 = arith.extui %104 : vector<8x8x36xi1> to vector<8x8x36xi32>
    %106 = arith.sitofp %105 : vector<8x8x36xi32> to vector<8x8x36xf32>
    %107 = vector.shape_cast %99 : vector<8x8xf32> to vector<8x8x1xf32>
    %108 = vector.broadcast %107 : vector<8x8x1xf32> to vector<8x8x36xf32>
    %109 = arith.mulf %108, %106 : vector<8x8x36xf32>
    %cst_60 = arith.constant dense<0.000000e+00> : vector<8x36xf32>
    %110 = vector.multi_reduction <add>, %109, %cst_60 [1] : vector<8x8x36xf32> to vector<8x36xf32>
    %111 = vector.broadcast %77 : vector<8x1xf32> to vector<8x36xf32>
    %112 = arith.mulf %111, %95 : vector<8x36xf32>
    %113 = arith.addf %112, %110 : vector<8x36xf32>
    %cst_61 = arith.constant 0.000000e+00 : f32
    %114 = vector.broadcast %cst_61 : f32 to vector<8x43xf32>
    %115 = tpu.concatenate %40, %36, %41, %77, %113, %114 in 1 : vector<8x32xf32>, vector<8x8xf32>, vector<8x8xf32>, vector<8x1xf32>, vector<8x36xf32>, vector<8x43xf32> -> vector<8x128xf32>
    %c0_62 = arith.constant 0 : index
    %c0_63 = arith.constant 0 : index
    %116 = vector.load %arg22[%c0_62, %c0_63] : memref<8x128xf32, #tpu.memory_space<vmem>>, vector<8x128xf32>
    tpu.vector_store %arg22[%c0_62, %c0_63], %115 {strides = array<i32>} : memref<8x128xf32, #tpu.memory_space<vmem>>, vector<8x128xf32>,
    return
  }
}

</mosaic_0001>

<bundles_post_ra>
// kernel: pointer_decoder_forward.1
= control target key start
LH: loop header
LB: loop body
LE: loop exit
PB: predicated region body
PF: predicated region fallthrough
CT: control target
= control target key end

     0   :  { %v182_v0 = vlaneseq  ;;  %v1748_v1 = vmov 0.0   ;;  %vm1749_vm0 = vmmov 0   ;;  %vm103_vm1 = vcmask 261120   ;;  %s2335_s8 = inlined_call_operand.vmem [shape: f32[32,32], index: 8, kind: input, shape index: {}]   ;;  %s2336_s4 = inlined_call_operand.vmem [shape: f32[8,8], index: 4, kind: input, shape index: {}]   ;;  %s2337_s0 = inlined_call_operand.vmem [shape: f32[8,32], index: 0, kind: input, shape index: {}]   ;;  %s2338_s9 = inlined_call_operand.vmem [shape: f32[1,32], index: 9, kind: input, shape index: {}]   ;;  %s2339_s10 = inlined_call_operand.vmem [shape: f32[1,32], index: 10, kind: input, shape index: {}]   ;;  %s2340_s2 = inlined_call_operand.vmem [shape: f32[8,8,32], index: 2, kind: input, shape index: {}]   ;;  %s2341_s11 = inlined_call_operand.vmem [shape: f32[1,32], index: 11, kind: input, shape index: {}]   ;;  %s2342_s3 = inlined_call_operand.vmem [shape: f32[8,8], index: 3, kind: input, shape index: {}]   ;;  %s2343_s13 = inlined_call_operand.vmem [shape: f32[16,16], index: 13, kind: input, shape index: {}]   ;;  %s2344_s6 = inlined_call_operand.vmem [shape: f32[1,16], index: 6, kind: input, shape index: {}]   ;;  %s2345_s12 = inlined_call_operand.vmem [shape: f32[32,16], index: 12, kind: input, shape index: {}]   ;;  %s2346_s5 = inlined_call_operand.vmem [shape: f32[8,32], index: 5, kind: input, shape index: {}]   ;;  %s2347_s19 = inlined_call_operand.vmem [shape: f32[32,36], index: 19, kind: input, shape index: {}]   ;;  %s2348_s20 = inlined_call_operand.vmem [shape: f32[32,36], index: 20, kind: input, shape index: {}]   ;;  %s2349_s16 = inlined_call_operand.vmem [shape: f32[1,32], index: 16, kind: input, shape index: {}]   ;;  %s2350_s1 = inlined_call_operand.vmem [shape: f32[8,8,32], index: 1, kind: input, shape index: {}]   ;;  %s2351_s15 = inlined_call_operand.vmem [shape: f32[1,32], index: 15, kind: input, shape index: {}]   ;;  %s2352_s14 = inlined_call_operand.vmem [shape: f32[1,16], index: 14, kind: input, shape index: {}]   ;;  %s2353_s17 = inlined_call_operand.vmem [shape: f32[1,16], index: 17, kind: input, shape index: {}]   ;;  %s2354_s18 = inlined_call_operand.<no memory space> [shape: f32[1,1], index: 18, kind: input, shape index: {}]   ;;  %s2355_s7 = inlined_call_operand.vmem [shape: s32[8,8], index: 7, kind: input, shape index: {}]   ;;  %s2356_s21 = inlined_call_operand.vmem [shape: f32[1,36], index: 21, kind: input, shape index: {}]   ;;  %s2357_s22 = inlined_call_operand.vmem [shape: f32[8,128], index: 22, kind: output, shape index: {}]  }
   0x1   :  { %2361 = sst [smem:[#allocation3_spill]] %s2335_s8  ;;  %1645 = vmatprep.subr.mxu0 %v1748_v1  ;;  %1653 = vmatprep.mubr.msk.f32.mxu0 %vm1749_vm0, %v1748_v1  ;;  %v1750_v26 = vmov 1966171168   ;;  %vm443_vm2 = vcmask 1041409   ;;  %vm445_vm3 = vcmask 1042434   ;;  %vm447_vm4 = vcmask 1043459  }
   0x2   :  { %2362 = sst [smem:[#allocation4_spill]] %s2336_s4  ;;  %v1880_v4 = vshrl.u32 %v182_v0, 7  ;;  %1656 = vmatprep.subr.mxu1 %v1748_v1  ;;  %1660 = vmatprep.mubr.msk.f32.mxu1 %vm1749_vm0, %v1748_v1  ;;  %v180_v27 = vunpack.c.l.s4 %v1750_v26  ;;  %vm449_vm5 = vcmask 1044484   ;;  %vm451_vm6 = vcmask 1045509  }
   0x3   :  { %2363 = sst [smem:[#allocation5_spill]] %s2337_s0  ;;  %vm453_vm7 = vcmask 1046534   ;;  %vm455_vm8 = vcmask 1047559   ;;  %vm458_vm9 = vcmask 64512   ;;  %vm878_vm10 = vcmask 130048  }
   0x4   :  { %2364 = sst [smem:[#allocation6_spill]] %s2338_s9  ;;  %v1893_v7 = vsub.s32 0, %v1880_v4  ;;  %v1896_v8 = vsub.s32 2, %v1880_v4  ;;  %v1899_v9 = vsub.s32 1, %v1880_v4  ;;  %v1906_v11 = vsub.s32 3, %v1880_v4 }
   0x5   :  { %2365 = sst [smem:[#allocation7_spill]] %s2339_s10  ;;  %v1918_v16 = vsub.s32 4, %v1880_v4  ;;  %v1924_v18 = vsub.s32 5, %v1880_v4  ;;  %v1931_v20 = vsub.s32 6, %v1880_v4  ;;  %v1935_v22 = vsub.s32 7, %v1880_v4 }
   0x6   :  { %2366 = sst [smem:[#allocation8_spill]] %s2340_s2  ;;  %v181_v28 = vunpack.c.0.s8 %v180_v27  ;;  %vm1289_vm11 = vcmask 293888  }
   0x7   :  { %2367 = sst [smem:[#allocation9_spill]] %s2341_s11 }
   0x8   :  { %s2368_s29 = sld [smem:[#allocation3_spill]]  ;;  %v184_v32 = vsub.s32 %v181_v28, %v1880_v4 }
   0x9   :  { %s2369_s24 = sld [smem:[#allocation4_spill]] }
   0xa   :  { %s2370_s27 = sld [smem:[#allocation5_spill]] }
   0xb   :  { %s2372_s8 = sld [smem:[#allocation7_spill]] }
   0xc   :  { %s2373_s4 = sld [smem:[#allocation8_spill]] }
   0xd   :  { %s2374_s0 = sld [smem:[#allocation9_spill]] }
   0xe   :  { %v95_v2 = vld [vmem:[%s2368_s29 + $0x18] sm:$0xff]  ;;  %v94_v3 = vld [vmem:[%s2368_s29 + $0x10] sm:$0xff]  ;;  %v93_v5 = vld [vmem:[%s2368_s29 + $0x8] sm:$0xff] }
   0xf   :  { %1646 = vmatpush3.msra.mxu0 %v95_v2  ;;  %v91_v6 = vld [vmem:[%s2369_s24] sm:$0xff] }
  0x10   :  { %1647 = vmatprep.subr.mxu0 %v1748_v1  ;;  %v92_v10 = vld [vmem:[%s2368_s29] sm:$0xff]  ;;  %v278_v13 = vrot.slane %v91_v6, %v1893_v7  ;;  %v292_v14 = vrot.slane %v91_v6, %v1896_v8  ;;  %v285_v15 = vrot.slane %v91_v6, %v1899_v9  ;;  %v299_v17 = vrot.slane %v91_v6, %v1906_v11  ;;  %s2371_s29 = sld [smem:[#allocation6_spill]] }
  0x11   :  { %1648 = vmatpush3.msra.mxu0 %v94_v3  ;;  %v1911_v12 = vld [vmem:[%s2370_s27] sm:$0xff]  ;;  %v306_v19 = vrot.slane %v91_v6, %v1918_v16  ;;  %v313_v21 = vrot.slane %v91_v6, %v1924_v18  ;;  %v320_v23 = vrot.slane %v91_v6, %v1931_v20  ;;  %v327_v24 = vrot.slane %v91_v6, %v1935_v22 }
  0x12   :  { %1649 = vmatprep.subr.mxu0 %v1748_v1  ;;  %280 = vbcast.lane.b32.xlu0 %v278_v13, 256  ;;  %v1601_v38 = vld [vmem:[%s2372_s8] ss:$0 sm:$0xff]  ;;  %v84_v55 = vld [vmem:[%s2373_s4 + $0x10] sm:$0xff]  ;;  %v83_v56 = vld [vmem:[%s2373_s4 + $0x8] sm:$0xff] }
  0x13   :  { %1650 = vmatpush3.msra.mxu0 %v93_v5  ;;  %294 = vbcast.lane.b32.xlu1 %v292_v14, 256  ;;  %v82_v47 = vld [vmem:[%s2373_s4] sm:$0xff]  ;;  %v85_v5 = vld [vmem:[%s2373_s4 + $0x18] sm:$0xff] }
  0x14   :  { %1651 = vmatprep.subr.mxu0 %v1748_v1  ;;  %v86_v58 = vld [vmem:[%s2373_s4 + $0x20] sm:$0xff] }
  0x15   :  { %1652 = vmatpush3.msra.mxu0 %v92_v10 }
  0x16   :  { %1654 = vmatmul.mubr.msk.f32.vlgmr.msra.gmra.mxu0 %vm103_vm1, %v1911_v12  ;;  %1674 = vmatprep.subr.mxu0 %v1748_v1  ;;  %v1599_v31 = vld [vmem:[%s2371_s29] ss:$0 sm:$0xff] }
  0x17   :  { %1682 = vmatprep.mubr.msk.f32.mxu0 %vm1749_vm0, %v1748_v1  ;;  %287 = vbcast.lane.b32.xlu0 %v285_v15, 256 }
  0x18   :  { %301 = vbcast.lane.b32.xlu1 %v299_v17, 256 }
  0x1b   :  { %308 = vbcast.lane.b32.xlu0 %v306_v19, 256 }
  0x1c   :  { %315 = vbcast.lane.b32.xlu1 %v313_v21, 256  ;;  %v87_v21 = vld [vmem:[%s2373_s4 + $0x28] sm:$0xff] }
  0x1f   :  { %322 = vbcast.lane.b32.xlu0 %v320_v23, 256  ;;  %v88_v23 = vld [vmem:[%s2373_s4 + $0x30] sm:$0xff] }
  0x20   :  { %329 = vbcast.lane.b32.xlu1 %v327_v24, 256 }
  0x84   :  { %v281_v25 = vpop.permute.xlu0 %280 }
  0x85   :  { %v295_v29 = vpop.permute.xlu1 %294  ;;  %v338_v44 = vmul.f32 %v1601_v38, %v281_v25 }
  0x86   :  { %v340_v45 = vmul.f32 %v1601_v38, %v295_v29 }
  0x89   :  { %v288_v30 = vpop.permute.xlu0 %287 }
  0x8a   :  { %v302_v35 = vpop.permute.xlu1 %301  ;;  %v339_v46 = vmul.f32 %v1601_v38, %v288_v30 }
  0x8b   :  { %v341_v57 = vmul.f32 %v1601_v38, %v302_v35 }
  0x8d   :  { %v309_v36 = vpop.permute.xlu0 %308 }
  0x8e   :  { %v316_v52 = vpop.permute.xlu1 %315  ;;  %v342_v59 = vmul.f32 %v1601_v38, %v309_v36 }
  0x8f   :  { %v343_v60 = vmul.f32 %v1601_v38, %v316_v52 }
  0x91   :  { %v323_v53 = vpop.permute.xlu0 %322 }
  0x92   :  { %v344_v13 = vmul.f32 %v1601_v38, %v323_v53  ;;  %v330_v36 = vpop.permute.xlu1 %329 }
  0xd6   :  { %v173_v33 = vpop.f32.mrf.mxu0 }
  0xd7   :  { %v174_v34 = vadd.f32 %v1599_v31, %v173_v33 }
  0xd8   :  { %v1655_v37 = vpop.f32.mrf.mxu0 }
  0xd9   :  { %v178_v39 = vcombine.high %v174_v34, %v174_v34  ;;  %v185_v40 = vrot.slane %v174_v34, %v184_v32  ;;  %v89_v37 = vld [vmem:[%s2373_s4 + $0x38] sm:$0xff]  ;;  %s1753_s4 = smov 40  }
  0xdb   :  { %v192_v41 = vrot.slane %v178_v39, %v184_v32  ;;  %v193_v42 = vcombine.high %v185_v40, %v185_v40  ;;  %v201_v43 = vrot.slane %v185_v40, %v184_v32 }
  0xdd   :  { %v194_v48 = vcombine.high %v192_v41, %v192_v41  ;;  %v208_v49 = vrot.slane %v192_v41, %v184_v32  ;;  %v215_v50 = vrot.slane %v193_v42, %v184_v32  ;;  %v223_v51 = vcombine.high %v201_v43, %v201_v43 }
  0xde   :  { %v230_v54 = vrot.slane %v201_v43, %v1893_v7  ;;  %v345_v42 = vmul.f32 %v1601_v38, %v330_v36 }
  0xdf   :  { %v238_v61 = vrot.slane %v223_v51, %v1893_v7  ;;  %v234_v62 = vrot.slane %v215_v50, %v1893_v7  ;;  %v225_v63 = vcombine.high %v215_v50, %v215_v50  ;;  %v246_v2 = vrot.slane %v208_v49, %v1893_v7 }
  0xe0   :  { %v267_v3 = vadd.f32 %v230_v54, %v82_v47  ;;  %v222_v6 = vrot.slane %v194_v48, %v184_v32  ;;  %v224_v10 = vcombine.high %v208_v49, %v208_v49 }
  0xe1   :  { %v269_v14 = vadd.f32 %v238_v61, %v84_v55  ;;  %v268_v15 = vadd.f32 %v234_v62, %v83_v56  ;;  %v242_v17 = vrot.slane %v225_v63, %v1893_v7  ;;  %v271_v19 = vadd.f32 %v246_v2, %v86_v58 }
  0xe2   :  { %v346_v24 = vadd.f32 %v338_v44, %v267_v3  ;;  %v250_v25 = vrot.slane %v222_v6, %v1893_v7  ;;  %v254_v26 = vrot.slane %v224_v10, %v1893_v7  ;;  %v226_v27 = vcombine.high %v222_v6, %v222_v6  ;;  %v1602_v44 = vld [vmem:[%s2374_s0] ss:$0 sm:$0xff] }
  0xe3   :  { %v348_v28 = vadd.f32 %v340_v45, %v269_v14  ;;  %v347_v29 = vadd.f32 %v339_v46, %v268_v15  ;;  %v270_v30 = vadd.f32 %v242_v17, %v85_v5  ;;  %v350_v31 = vadd.f32 %v342_v59, %v271_v19  ;;  %v90_v10 = vld [vmem:[%s2342_s3] sm:$0xff] }
  0xe4   :  { %1705 = vtanh.f32 %v346_v24  ;;  %v272_v32 = vadd.f32 %v250_v25, %v87_v21  ;;  %v273_v33 = vadd.f32 %v254_v26, %v88_v23  ;;  %v258_v34 = vrot.slane %v226_v27, %v1893_v7 }
  0xe5   :  { %1707 = vtanh.f32 %v348_v28  ;;  %v349_v35 = vadd.f32 %v341_v57, %v270_v30  ;;  %v545_v14 = vrot.slane %v90_v10, %v1896_v8  ;;  %v531_v15 = vrot.slane %v90_v10, %v1893_v7 }
  0xe6   :  { %1709 = vtanh.f32 %v347_v29  ;;  %v352_v39 = vadd.f32 %v344_v13, %v273_v33  ;;  %v351_v40 = vadd.f32 %v343_v60, %v272_v32  ;;  %v274_v41 = vadd.f32 %v258_v34, %v89_v37 }
  0xe7   :  { %1711 = vtanh.f32 %v349_v35  ;;  %v538_v13 = vrot.slane %v90_v10, %v1899_v9  ;;  %v552_v17 = vrot.slane %v90_v10, %v1906_v11  ;;  %v566_v19 = vrot.slane %v90_v10, %v1924_v18 }
  0xe8   :  { %1713 = vtanh.f32 %v350_v31  ;;  %v353_v43 = vadd.f32 %v345_v42, %v274_v41  ;;  %v580_v21 = vrot.slane %v90_v10, %v1935_v22  ;;  %v1999_v23 = vand.u32 127, %v182_v0 }
  0xe9   :  { %1715 = vtanh.f32 %v352_v39 }
  0xea   :  { %1717 = vtanh.f32 %v351_v40  ;;  %v2003_v25 = vsub.s32 %v1999_v23, %v1880_v4 }
  0xeb   :  { %1719 = vtanh.f32 %v353_v43 }
  0xf1   :  { %v1706_v45 = vpop.eup %1705 }
  0xf2   :  { %v1708_v46 = vpop.eup %1707  ;;  %v369_v47 = vmul.f32 %v1706_v45, %v1602_v44 }
  0xf3   :  { %v1710_v48 = vpop.eup %1709  ;;  %v371_v52 = vmul.f32 %v1708_v46, %v1602_v44 }
  0xf4   :  { %v1712_v49 = vpop.eup %1711  ;;  %v377_v50 = vsel %vm103_vm1, %v369_v47, 0.0  ;;  %v370_v51 = vmul.f32 %v1710_v48, %v1602_v44 }
  0xf5   :  { %v1714_v53 = vpop.eup %1713  ;;  %378 = vadd.xlane.f32.xlu0 %v377_v50  ;;  %v383_v56 = vsel %vm103_vm1, %v371_v52, 0.0  ;;  %v372_v57 = vmul.f32 %v1712_v49, %v1602_v44  ;;  %v559_v49 = vrot.slane %v90_v10, %v1918_v16  ;;  %v573_v50 = vrot.slane %v90_v10, %v1931_v20 }
  0xf6   :  { %v380_v38 = vsel %vm103_vm1, %v370_v51, 0.0  ;;  %v373_v54 = vmul.f32 %v1714_v53, %v1602_v44  ;;  %v1716_v55 = vpop.eup %1715  ;;  %v1751_v51 = vmov 0  }
  0xf7   :  { %381 = vadd.xlane.f32.xlu1 %v380_v38  ;;  %v1718_v58 = vpop.eup %1717  ;;  %v375_v60 = vmul.f32 %v1716_v55, %v1602_v44  ;;  %v386_v61 = vsel %vm103_vm1, %v372_v57, 0.0  ;;  %1704 = vset.pattern.permute.xlu0 %v1751_v51 }
  0xf8   :  { %v389_v59 = vsel %vm103_vm1, %v373_v54, 0.0  ;;  %v374_v62 = vmul.f32 %v1718_v58, %v1602_v44  ;;  %v1720_v63 = vpop.eup %1719  ;;  %1703 = vset.pattern.permute.xlu1 %v1751_v51  ;;  %v876_v51 = vld [vmem:[%s2343_s13] sm:$0xff] }
  0xf9   :  { %384 = vadd.xlane.f32.xlu0 %v383_v56  ;;  %v395_v2 = vsel %vm103_vm1, %v375_v60, 0.0  ;;  %v376_v5 = vmul.f32 %v1720_v63, %v1602_v44 }
  0xfa   :  { %v392_v3 = vsel %vm103_vm1, %v374_v62, 0.0 }
  0xfb   :  { %390 = vadd.xlane.f32.xlu1 %v389_v59  ;;  %v398_v6 = vsel %vm103_vm1, %v376_v5, 0.0 }
  0xfd   :  { %387 = vadd.xlane.f32.xlu0 %v386_v61 }
  0xff   :  { %396 = vadd.xlane.f32.xlu1 %v395_v2 }
 0x101   :  { %393 = vadd.xlane.f32.xlu0 %v392_v3 }
 0x105   :  { %399 = vadd.xlane.f32.xlu0 %v398_v6 }
 0x110   :  { %540 = vbcast.lane.b32.xlu1 %v538_v13, 256 }
 0x114   :  { %547 = vbcast.lane.b32.xlu1 %v545_v14, 256 }
 0x11b   :  { %533 = vbcast.lane.b32.xlu0 %v531_v15, 256 }
 0x11f   :  { %554 = vbcast.lane.b32.xlu0 %v552_v17, 256 }
 0x123   :  { %568 = vbcast.lane.b32.xlu0 %v566_v19, 256 }
 0x127   :  { %582 = vbcast.lane.b32.xlu0 %v580_v21, 256 }
 0x17e   :  { %v379_v24 = vpop.xlane.xlu0 %378 }
 0x17f   :  { %v414_v29 = vrot.slane %v379_v24, %v2003_v25 }
 0x180   :  { %v382_v26 = vpop.xlane.xlu1 %381 }
 0x181   :  { %v418_v27 = vrot.slane %v382_v26, %v2003_v25 }
 0x182   :  { %v385_v28 = vpop.xlane.xlu0 %384 }
 0x183   :  { %v422_v30 = vrot.slane %v385_v28, %v2003_v25  ;;  %v444_v31 = vsel %vm443_vm2, %v418_v27, %v414_v29 }
 0x184   :  { %v391_v32 = vpop.xlane.xlu1 %390 }
 0x185   :  { %v446_v34 = vsel %vm445_vm3, %v422_v30, %v444_v31  ;;  %v430_v36 = vrot.slane %v391_v32, %v2003_v25 }
 0x186   :  { %v388_v0 = vpop.xlane.xlu0 %387 }
 0x187   :  { %v426_v33 = vrot.slane %v388_v0, %v2003_v25 }
 0x188   :  { %v397_v39 = vpop.xlane.xlu1 %396 }
 0x189   :  { %v448_v35 = vsel %vm447_vm4, %v426_v33, %v446_v34  ;;  %v438_v43 = vrot.slane %v397_v39, %v2003_v25 }
 0x18a   :  { %v394_v37 = vpop.xlane.xlu0 %393  ;;  %v450_v41 = vsel %vm449_vm5, %v430_v36, %v448_v35 }
 0x18b   :  { %v434_v40 = vrot.slane %v394_v37, %v2003_v25 }
 0x18c   :  { %v541_v52 = vpop.permute.xlu1 %540 }
 0x18d   :  { %v452_v42 = vsel %vm451_vm6, %v434_v40, %v450_v41 }
 0x18e   :  { %v400_v44 = vpop.xlane.xlu0 %399  ;;  %v454_v46 = vsel %vm453_vm7, %v438_v43, %v452_v42 }
 0x18f   :  { %v442_v45 = vrot.slane %v400_v44, %v2003_v25 }
 0x190   :  { %v548_v53 = vpop.permute.xlu1 %547 }
 0x191   :  { %v456_v47 = vsel %vm455_vm8, %v442_v45, %v454_v46 }
 0x192   :  { %v459_v48 = vsel %vm458_vm9, %v456_v47, -inf  ;;  %v534_v27 = vpop.permute.xlu0 %533 }
 0x193   :  { %460 = vmax.xlane.f32.xlu1 %v459_v48 }
 0x196   :  { %v555_v31 = vpop.permute.xlu0 %554 }
 0x19a   :  { %v569_v40 = vpop.permute.xlu0 %568 }
 0x19e   :  { %v583_v48 = vpop.permute.xlu0 %582 }
 0x1a4   :  { %561 = vbcast.lane.b32.xlu1 %v559_v49, 256 }
 0x1a8   :  { %575 = vbcast.lane.b32.xlu1 %v573_v50, 256  ;;  %v877_v50 = vld [vmem:[%s2343_s13 + $0x8] sm:$0xff] }
 0x1a9   :  { %1657 = vmatpush3.msra.mxu1 %v877_v50 }
 0x1aa   :  { %1658 = vmatprep.subr.mxu1 %v1748_v1 }
 0x1ab   :  { %1659 = vmatpush3.msra.mxu1 %v876_v51 }
 0x1ac   :  { %1663 = vmatprep.subr.mxu1 %v1748_v1 }
 0x21c   :  { %v461_v38 = vpop.xlane.xlu1 %460 }
 0x21d   :  { %v470_v54 = vrot.slane %v461_v38, %v1899_v9  ;;  %v466_v55 = vrot.slane %v461_v38, %v1893_v7  ;;  %v474_v56 = vrot.slane %v461_v38, %v1896_v8  ;;  %v482_v58 = vrot.slane %v461_v38, %v1918_v16 }
 0x21e   :  { %v478_v59 = vrot.slane %v461_v38, %v1906_v11  ;;  %v490_v2 = vrot.slane %v461_v38, %v1931_v20  ;;  %v486_v5 = vrot.slane %v461_v38, %v1924_v18  ;;  %v494_v19 = vrot.slane %v461_v38, %v1935_v22  ;;  %v874_v38 = vld [vmem:[%s2345_s12 + $0x10] sm:$0xff] }
 0x21f   :  { %v503_v57 = vsub.f32 %v379_v24, %v466_v55  ;;  %v504_v61 = vsub.f32 %v382_v26, %v470_v54  ;;  %v505_v62 = vsub.f32 %v385_v28, %v474_v56  ;;  %v507_v63 = vsub.f32 %v391_v32, %v482_v58  ;;  %v873_v54 = vld [vmem:[%s2345_s12 + $0x8] sm:$0xff]  ;;  %v872_v55 = vld [vmem:[%s2345_s12] sm:$0xff] }
 0x220   :  { %v506_v3 = vsub.f32 %v388_v0, %v478_v59  ;;  %v509_v14 = vsub.f32 %v397_v39, %v490_v2  ;;  %v508_v17 = vsub.f32 %v394_v37, %v486_v5  ;;  %v510_v26 = vsub.f32 %v400_v44, %v494_v19  ;;  %v562_v0 = vpop.permute.xlu1 %561  ;;  %v870_v56 = vld [vmem:[%s2346_s5] sm:$0xff] }
 0x221   :  { %v511_v60 = vmul.f32 1.442695, %v503_v57  ;;  %v513_v6 = vmul.f32 1.442695, %v504_v61  ;;  %v515_v10 = vmul.f32 1.442695, %v505_v62 }
 0x222   :  { %v519_v13 = vmul.f32 1.442695, %v507_v63  ;;  %v517_v15 = vmul.f32 1.442695, %v506_v3  ;;  %v523_v21 = vmul.f32 1.442695, %v509_v14 }
 0x223   :  { %1721 = vpow2.f32 %v511_v60  ;;  %v521_v24 = vmul.f32 1.442695, %v508_v17  ;;  %v525_v29 = vmul.f32 1.442695, %v510_v26 }
 0x224   :  { %1723 = vpow2.f32 %v513_v6  ;;  %v576_v43 = vpop.permute.xlu1 %575 }
 0x225   :  { %1725 = vpow2.f32 %v515_v10 }
 0x226   :  { %1727 = vpow2.f32 %v519_v13 }
 0x227   :  { %1729 = vpow2.f32 %v517_v15 }
 0x228   :  { %1731 = vpow2.f32 %v523_v21 }
 0x229   :  { %1733 = vpow2.f32 %v521_v24 }
 0x22a   :  { %1735 = vpow2.f32 %v525_v29 }
 0x230   :  { %v1722_v28 = vpop.eup %1721 }
 0x231   :  { %v2031_v30 = vmul.f32 %v1722_v28, %v534_v27  ;;  %v1724_v32 = vpop.eup %1723 }
 0x232   :  { %v1726_v33 = vpop.eup %1725  ;;  %v2034_v34 = vmul.f32 %v1724_v32, %v541_v52  ;;  %v871_v52 = vld [vmem:[%s2344_s6] sm:$0x1] }
 0x233   :  { %609 = vperm.xlu1 %1703, %v2031_v30   ;;  %v1728_v35 = vpop.eup %1727  ;;  %v2036_v36 = vmul.f32 %v1726_v33, %v548_v53  ;;  %v875_v53 = vld [vmem:[%s2345_s12 + $0x18] sm:$0xff]  ;;  %1661 = vmatmul.mubr.msk.f32.vlgmr.msra.gmra.mxu1 %vm878_vm10, %v871_v52 }
 0x234   :  { %v1730_v37 = vpop.eup %1729  ;;  %612 = vperm.xlu0 %1704, %v2034_v34   ;;  %v2040_v39 = vmul.f32 %v1728_v35, %v562_v0  ;;  %1664 = vmatpush3.msra.mxu1 %v875_v53 }
 0x235   :  { %v1732_v41 = vpop.eup %1731  ;;  %v2042_v42 = vmul.f32 %v1730_v37, %v555_v31  ;;  %1671 = vmatprep.mubr.msk.f32.mxu1 %vm1749_vm0, %v1748_v1  ;;  %1665 = vmatprep.subr.mxu1 %v1748_v1 }
 0x236   :  { %v1734_v44 = vpop.eup %1733  ;;  %v2046_v45 = vmul.f32 %v1732_v41, %v576_v43  ;;  %1666 = vmatpush3.msra.mxu1 %v874_v38  ;;  %v1117_v38 = vld [vmem:[%s2347_s19 + $0x8] sm:$0xff] }
 0x237   :  { %615 = vperm.xlu1 %1703, %v2036_v36   ;;  %v2048_v46 = vmul.f32 %v1734_v44, %v569_v40  ;;  %v1736_v47 = vpop.eup %1735  ;;  %1667 = vmatprep.subr.mxu1 %v1748_v1 }
 0x238   :  { %621 = vperm.xlu0 %1704, %v2040_v39   ;;  %v2052_v49 = vmul.f32 %v1736_v47, %v583_v48  ;;  %1668 = vmatpush3.msra.mxu1 %v873_v54 }
 0x239   :  { %1669 = vmatprep.subr.mxu1 %v1748_v1 }
 0x23a   :  { %1670 = vmatpush3.msra.mxu1 %v872_v55 }
 0x23b   :  { %618 = vperm.xlu1 %1703, %v2042_v42   ;;  %1672 = vmatmul.mubr.msk.f32.vlgmr.msra.gmra.mxu1 %vm103_vm1, %v870_v56  ;;  %v1121_v56 = vld [vmem:[%s2348_s20 + $0x8] sm:$0xff] }
 0x23c   :  { %627 = vperm.xlu0 %1704, %v2046_v45   ;;  %1685 = vmatprep.subr.mxu1 %v1748_v1 }
 0x23d   :  { %1693 = vmatprep.mubr.msk.f32.mxu1 %vm1749_vm0, %v1748_v1 }
 0x23f   :  { %624 = vperm.xlu1 %1703, %v2048_v46  }
 0x243   :  { %630 = vperm.xlu1 %1703, %v2052_v49  }
 0x2ae   :  { %v610_v57 = vpop.permute.xlu1 %609 }
 0x2af   :  { %v613_v58 = vpop.permute.xlu0 %612  ;;  %v635_v60 = vrot.slane %v610_v57, %v2003_v25  ;;  %v1116_v57 = vld [vmem:[%s2347_s19] sm:$0xff] }
 0x2b0   :  { %v639_v61 = vrot.slane %v613_v58, %v2003_v25  ;;  %v1120_v58 = vld [vmem:[%s2348_s20] sm:$0xff] }
 0x2b2   :  { %v616_v59 = vpop.permute.xlu1 %615  ;;  %v664_v3 = vsel %vm443_vm2, %v639_v61, %v635_v60 }
 0x2b3   :  { %v643_v62 = vrot.slane %v616_v59, %v2003_v25  ;;  %v622_v63 = vpop.permute.xlu0 %621 }
 0x2b4   :  { %v651_v13 = vrot.slane %v622_v63, %v2003_v25 }
 0x2b5   :  { %v665_v6 = vsel %vm445_vm3, %v643_v62, %v664_v3  ;;  %v1607_v62 = vld [vmem:[%s2349_s16] ss:$0 sm:$0xff]  ;;  %v1533_v3 = vadd.s32 4294967264, %v1999_v23 }
 0x2b6   :  { %v619_v2 = vpop.permute.xlu1 %618  ;;  %v1085_v63 = vmul.f32 %v1607_v62, %v1911_v12 }
 0x2b7   :  { %v647_v5 = vrot.slane %v619_v2, %v2003_v25  ;;  %v628_v15 = vpop.permute.xlu0 %627 }
 0x2b8   :  { %v659_v24 = vrot.slane %v628_v15, %v2003_v25  ;;  %v1086_v2 = vsel %vm103_vm1, %v1085_v63, 0.0 }
 0x2b9   :  { %v666_v10 = vsel %vm447_vm4, %v647_v5, %v665_v6  ;;  %v2165_v6 = vsub.s32 %v1533_v3, %v1880_v4  ;;  %v76_v4 = vld [vmem:[%s2350_s1 + $0x10] sm:$0xff] }
 0x2ba   :  { %v625_v14 = vpop.permute.xlu1 %624  ;;  %v667_v19 = vsel %vm449_vm5, %v651_v13, %v666_v10  ;;  %v75_v10 = vld [vmem:[%s2350_s1 + $0x8] sm:$0xff]  ;;  %v74_v13 = vld [vmem:[%s2350_s1] sm:$0xff] }
 0x2bb   :  { %v655_v17 = vrot.slane %v625_v14, %v2003_v25 }
 0x2bd   :  { %v668_v21 = vsel %vm451_vm6, %v655_v17, %v667_v19 }
 0x2be   :  { %v631_v26 = vpop.permute.xlu1 %630  ;;  %v669_v28 = vsel %vm453_vm7, %v659_v24, %v668_v21 }
 0x2bf   :  { %v663_v27 = vrot.slane %v631_v26, %v2003_v25 }
 0x2c1   :  { %v670_v29 = vsel %vm455_vm8, %v663_v27, %v669_v28 }
 0x2c2   :  { %v672_v31 = vsel %vm458_vm9, %v670_v29, 0.0 }
 0x2c3   :  { %673 = vadd.xlane.f32.xlu0 %v672_v31 }
 0x2f3   :  { %v948_v53 = vpop.f32.mrf.mxu1 }
 0x2f4   :  { %v955_v54 = vrot.slane %v948_v53, %v1893_v7 }
 0x2f5   :  { %v1662_v55 = vpop.f32.mrf.mxu1 }
 0x2fb   :  { %v1025_v59 = vpop.f32.mrf.mxu1 }
 0x2fc   :  { %v2153_v60 = vadd.f32 %v1025_v59, %v955_v54  ;;  %v79_v59 = vld [vmem:[%s2350_s1 + $0x28] sm:$0xff] }
 0x2fd   :  { %v1673_v61 = vpop.f32.mrf.mxu1 }
 0x34c   :  { %v674_v32 = vpop.xlane.xlu0 %673 }
 0x34d   :  { %1737 = vrcp.f32 %v674_v32 }
 0x35a   :  { %v1738_v0 = vpop.eup %1737 }
 0x35b   :  { %v680_v33 = vrot.slane %v1738_v0, %v1893_v7  ;;  %v684_v37 = vrot.slane %v1738_v0, %v1899_v9  ;;  %v688_v41 = vrot.slane %v1738_v0, %v1896_v8  ;;  %v692_v44 = vrot.slane %v1738_v0, %v1906_v11 }
 0x35c   :  { %v696_v48 = vrot.slane %v1738_v0, %v1918_v16  ;;  %v700_v50 = vrot.slane %v1738_v0, %v1924_v18  ;;  %v704_v51 = vrot.slane %v1738_v0, %v1931_v20  ;;  %v708_v52 = vrot.slane %v1738_v0, %v1935_v22 }
 0x35d   :  { %v717_v35 = vmul.f32 %v680_v33, %v2031_v30  ;;  %v718_v40 = vmul.f32 %v684_v37, %v2034_v34  ;;  %v719_v43 = vmul.f32 %v688_v41, %v2036_v36  ;;  %v720_v47 = vmul.f32 %v692_v44, %v2042_v42 }
 0x35e   :  { %v721_v30 = vmul.f32 %v696_v48, %v2040_v39  ;;  %v722_v34 = vmul.f32 %v700_v50, %v2048_v46  ;;  %v723_v36 = vmul.f32 %v704_v51, %v2046_v45  ;;  %v724_v42 = vmul.f32 %v708_v52, %v2052_v49  ;;  %v1119_v39 = vld [vmem:[%s2347_s19 + $0x18] sm:$0xff]  ;;  %v1118_v46 = vld [vmem:[%s2347_s19 + $0x10] sm:$0xff]  ;;  %v78_v52 = vld [vmem:[%s2350_s1 + $0x20] sm:$0xff] }
 0x35f   :  { %727 = vperm.xlu1 %1703, %v717_v35   ;;  %1686 = vmatpush3.msra.mxu1 %v1119_v39  ;;  %v1123_v45 = vld [vmem:[%s2348_s20 + $0x18] sm:$0xff]  ;;  %v1122_v49 = vld [vmem:[%s2348_s20 + $0x10] sm:$0xff] }
 0x360   :  { %1687 = vmatprep.subr.mxu1 %v1748_v1  ;;  %1675 = vmatpush3.msra.mxu0 %v1123_v45  ;;  %v77_v35 = vld [vmem:[%s2350_s1 + $0x18] sm:$0xff] }
 0x361   :  { %1688 = vmatpush3.msra.mxu1 %v1118_v46  ;;  %1676 = vmatprep.subr.mxu0 %v1748_v1 }
 0x362   :  { %1689 = vmatprep.subr.mxu1 %v1748_v1  ;;  %1677 = vmatpush3.msra.mxu0 %v1122_v49 }
 0x363   :  { %732 = vperm.xlu1 %1703, %v718_v40   ;;  %1690 = vmatpush3.msra.mxu1 %v1117_v38 }
 0x364   :  { %1678 = vmatprep.subr.mxu0 %v1748_v1  ;;  %1691 = vmatprep.subr.mxu1 %v1748_v1 }
 0x365   :  { %1679 = vmatpush3.msra.mxu0 %v1121_v56  ;;  %1692 = vmatpush3.msra.mxu1 %v1116_v57 }
 0x366   :  { %1680 = vmatprep.subr.mxu0 %v1748_v1  ;;  %1694 = vmatmul.mubr.msk.f32.vlgmr.msra.gmra.mxu1 %vm103_vm1, %v1911_v12 }
 0x367   :  { %737 = vperm.xlu1 %1703, %v719_v43   ;;  %1681 = vmatpush3.msra.mxu0 %v1120_v58 }
 0x36b   :  { %742 = vperm.xlu1 %1703, %v720_v47  }
 0x36f   :  { %747 = vperm.xlu1 %1703, %v721_v30  }
 0x373   :  { %752 = vperm.xlu1 %1703, %v722_v34  }
 0x377   :  { %757 = vperm.xlu1 %1703, %v723_v36  }
 0x37b   :  { %762 = vperm.xlu1 %1703, %v724_v42  }
 0x39f   :  { %1087 = vadd.xlane.f32.xlu1 %v1086_v2 }
 0x3da   :  { %v728_v5 = vpop.permute.xlu1 %727 }
 0x3db   :  { %v832_v14 = vrot.slane %v728_v5, %v2003_v25  ;;  %v1537_v15 = vrot.slane %v728_v5, %v2165_v6  ;;  %v765_v24 = vmul.f32 %v728_v5, %v74_v13 }
 0x3dd   :  { %v773_v37 = vsel %vm103_vm1, %v765_v24, 0.0 }
 0x3de   :  { %v733_v12 = vpop.permute.xlu1 %732  ;;  %v774_v34 = vrot.slane %v773_v37, 4 }
 0x3df   :  { %v766_v17 = vmul.f32 %v733_v12, %v75_v10  ;;  %v836_v19 = vrot.slane %v733_v12, %v2003_v25  ;;  %v1541_v21 = vrot.slane %v733_v12, %v2165_v6 }
 0x3e0   :  { %v775_v55 = vadd.f32 %v774_v34, %v773_v37 }
 0x3e1   :  { %v780_v26 = vsel %vm103_vm1, %v766_v17, 0.0  ;;  %v861_v27 = vsel %vm443_vm2, %v836_v19, %v832_v14  ;;  %v1566_v28 = vsel %vm443_vm2, %v1541_v21, %v1537_v15  ;;  %v80_v19 = vld [vmem:[%s2350_s1 + $0x30] sm:$0xff] }
 0x3e2   :  { %v738_v29 = vpop.permute.xlu1 %737  ;;  %v781_v33 = vrot.slane %v780_v26, 4  ;;  %v776_v12 = vrot.slane %v775_v55, 2 }
 0x3e3   :  { %v767_v31 = vmul.f32 %v738_v29, %v76_v4  ;;  %v840_v32 = vrot.slane %v738_v29, %v2003_v25  ;;  %v1545_v0 = vrot.slane %v738_v29, %v2165_v6 }
 0x3e4   :  { %v782_v51 = vadd.f32 %v781_v33, %v780_v26 }
 0x3e5   :  { %v787_v40 = vsel %vm103_vm1, %v767_v31, 0.0  ;;  %v862_v41 = vsel %vm445_vm3, %v840_v32, %v861_v27  ;;  %v1567_v43 = vsel %vm445_vm3, %v1545_v0, %v1566_v28 }
 0x3e6   :  { %v788_v44 = vrot.slane %v787_v40, 4  ;;  %v743_v47 = vpop.permute.xlu1 %742  ;;  %v783_v56 = vrot.slane %v782_v51, 2 }
 0x3e7   :  { %v768_v48 = vmul.f32 %v743_v47, %v77_v35  ;;  %v844_v30 = vrot.slane %v743_v47, %v2003_v25  ;;  %v1549_v50 = vrot.slane %v743_v47, %v2165_v6  ;;  %v777_v35 = vadd.f32 %v776_v12, %v775_v55 }
 0x3e8   :  { %v789_v36 = vadd.f32 %v788_v44, %v787_v40  ;;  %v784_v15 = vadd.f32 %v783_v56, %v782_v51 }
 0x3e9   :  { %v794_v42 = vsel %vm103_vm1, %v768_v48, 0.0  ;;  %v863_v39 = vsel %vm447_vm4, %v844_v30, %v862_v41  ;;  %v1568_v46 = vsel %vm447_vm4, %v1549_v50, %v1567_v43  ;;  %v81_v43 = vld [vmem:[%s2350_s1 + $0x38] sm:$0xff] }
 0x3ea   :  { %v795_v53 = vrot.slane %v794_v42, 4  ;;  %v748_v45 = vpop.permute.xlu1 %747  ;;  %v790_v57 = vrot.slane %v789_v36, 2  ;;  %v785_v37 = vrot.slane %v784_v15, 1 }
 0x3eb   :  { %v769_v49 = vmul.f32 %v748_v45, %v78_v52  ;;  %v848_v38 = vrot.slane %v748_v45, %v2003_v25  ;;  %v1553_v54 = vrot.slane %v748_v45, %v2165_v6 }
 0x3ec   :  { %v796_v58 = vadd.f32 %v795_v53, %v794_v42  ;;  %v791_v17 = vadd.f32 %v790_v57, %v789_v36  ;;  %v778_v53 = vrot.slane %v777_v35, 1  ;;  %v786_v45 = vadd.f32 %v785_v37, %v784_v15 }
 0x3ed   :  { %v801_v61 = vsel %vm103_vm1, %v769_v49, 0.0  ;;  %v864_v62 = vsel %vm449_vm5, %v848_v38, %v863_v39  ;;  %v1569_v63 = vsel %vm449_vm5, %v1553_v54, %v1568_v46 }
 0x3ee   :  { %v797_v2 = vrot.slane %v796_v58, 2  ;;  %v753_v3 = vpop.permute.xlu1 %752  ;;  %v802_v5 = vrot.slane %v801_v61, 4  ;;  %v792_v40 = vrot.slane %v791_v17, 1 }
 0x3ef   :  { %v770_v10 = vmul.f32 %v753_v3, %v79_v59  ;;  %v852_v13 = vrot.slane %v753_v3, %v2003_v25  ;;  %v1557_v14 = vrot.slane %v753_v3, %v2165_v6 }
 0x3f0   :  { %v803_v21 = vadd.f32 %v802_v5, %v801_v61  ;;  %v798_v27 = vadd.f32 %v797_v2, %v796_v58  ;;  %v793_v54 = vadd.f32 %v792_v40, %v791_v17 }
 0x3f1   :  { %v808_v4 = vsel %vm103_vm1, %v770_v10, 0.0  ;;  %v1570_v24 = vsel %vm451_vm6, %v1557_v14, %v1569_v63  ;;  %v865_v26 = vsel %vm451_vm6, %v852_v13, %v864_v62  ;;  %v779_v10 = vadd.f32 %v778_v53, %v777_v35 }
 0x3f2   :  { %v809_v28 = vrot.slane %v808_v4, 4  ;;  %v758_v29 = vpop.permute.xlu1 %757  ;;  %v804_v31 = vrot.slane %v803_v21, 2  ;;  %v799_v50 = vrot.slane %v798_v27, 1 }
 0x3f3   :  { %v771_v32 = vmul.f32 %v758_v29, %v80_v19  ;;  %v856_v0 = vrot.slane %v758_v29, %v2003_v25  ;;  %v1561_v33 = vrot.slane %v758_v29, %v2165_v6  ;;  %v1132_v17 = vsel %vm443_vm2, %v786_v45, %v779_v10 }
 0x3f4   :  { %v810_v41 = vadd.f32 %v809_v28, %v808_v4  ;;  %v805_v44 = vadd.f32 %v804_v31, %v803_v21  ;;  %v800_v58 = vadd.f32 %v799_v50, %v798_v27  ;;  %v1133_v29 = vsel %vm445_vm3, %v793_v54, %v1132_v17 }
 0x3f5   :  { %v815_v47 = vsel %vm103_vm1, %v771_v32, 0.0  ;;  %v1571_v48 = vsel %vm453_vm7, %v1561_v33, %v1570_v24  ;;  %v866_v30 = vsel %vm453_vm7, %v856_v0, %v865_v26  ;;  %v1605_v33 = vld [vmem:[%s2352_s14] ss:$0 sm:$0xff] }
 0x3f6   :  { %v811_v34 = vrot.slane %v810_v41, 2  ;;  %v816_v51 = vrot.slane %v815_v47, 4  ;;  %v763_v36 = vpop.permute.xlu1 %762  ;;  %v806_v52 = vrot.slane %v805_v44, 1  ;;  %v1134_v0 = vsel %vm447_vm4, %v800_v58, %v1133_v29 }
 0x3f7   :  { %v772_v42 = vmul.f32 %v763_v36, %v81_v43  ;;  %v860_v39 = vrot.slane %v763_v36, %v2003_v25  ;;  %v1565_v46 = vrot.slane %v763_v36, %v2165_v6  ;;  %v1606_v25 = vld [vmem:[%s2351_s15] ss:$0 sm:$0xff] }
 0x3f8   :  { %v812_v49 = vadd.f32 %v811_v34, %v810_v41  ;;  %v817_v38 = vadd.f32 %v816_v51, %v815_v47  ;;  %v807_v6 = vadd.f32 %v806_v52, %v805_v44  ;;  %v1045_v63 = vmul.f32 %v1606_v25, %v786_v45 }
 0x3f9   :  { %v822_v55 = vsel %vm103_vm1, %v772_v42, 0.0  ;;  %v2228_v56 = vsel %vm455_vm8, %v860_v39, %v866_v30  ;;  %v1572_v57 = vsel %vm455_vm8, %v1565_v46, %v1571_v48  ;;  %v1046_v13 = vmul.f32 %v1606_v25, %v793_v54  ;;  %v1608_v42 = vld [vmem:[%s2353_s17] ss:$0 sm:$0xff] }
 0x3fa   :  { %v813_v59 = vrot.slane %v812_v49, 1  ;;  %v818_v61 = vrot.slane %v817_v38, 2  ;;  %v823_v62 = vrot.slane %v822_v55, 4  ;;  %v1047_v14 = vmul.f32 %v1606_v25, %v800_v58 }
 0x3fb   :  { %v1048_v19 = vmul.f32 %v1606_v25, %v807_v6  ;;  %v1060_v21 = vrot.slane %v1045_v63, 7  ;;  %v1044_v27 = vmul.f32 %v1606_v25, %v779_v10  ;;  %v1062_v28 = vrot.slane %v1046_v13, 6 }
 0x3fc   :  { %v814_v2 = vadd.f32 %v813_v59, %v812_v49  ;;  %v819_v3 = vadd.f32 %v818_v61, %v817_v38  ;;  %v824_v5 = vadd.f32 %v823_v62, %v822_v55  ;;  %v1064_v31 = vrot.slane %v1047_v14, 5  ;;  %v1308_v61 = vld [vmem:[%s2355_s7] sm:$0xff] }
 0x3fd   :  { %v1135_v37 = vsel %vm449_vm5, %v807_v6, %v1134_v0  ;;  %v1066_v40 = vrot.slane %v1048_v19, 4  ;;  %v1061_v44 = vsel %vm443_vm2, %v1060_v21, %v1044_v27  ;;  %v1036_v30 = vadd.f32 %v1605_v33, %v2153_v60  ;;  %v1613_v21 = vld [vmem:[%s2356_s21] ss:$0 sm:$0xff]  ;;  %s1752_s21 = smov 48  }
 0x3fe   :  { %v820_v12 = vrot.slane %v819_v3, 1  ;;  %v825_v15 = vrot.slane %v824_v5, 2  ;;  %v1049_v26 = vmul.f32 %v1606_v25, %v814_v2  ;;  %v1136_v43 = vsel %vm451_vm6, %v814_v2, %v1135_v37 }
 0x3ff   :  { %v1063_v50 = vsel %vm445_vm3, %v1062_v28, %v1061_v44  ;;  %v1097_v49 = vmul.f32 %v1608_v42, %v1036_v30  ;;  %v27_v58 = vstv %s2354_s18  ;;  %v1312_v62 = vrot.slane %v1308_v61, %v1893_v7 }
 0x400   :  { %v821_v4 = vadd.f32 %v820_v12, %v819_v3  ;;  %v826_v24 = vadd.f32 %v825_v15, %v824_v5  ;;  %v1068_v47 = vrot.slane %v1049_v26, 3  ;;  %v1065_v52 = vsel %vm447_vm4, %v1064_v31, %v1063_v50  ;;  %28 = vst [vmem:[#allocation2] sm:$0x1] %v27_v58 }
 0x401   :  { %v1067_v39 = vsel %vm449_vm5, %v1066_v40, %v1065_v52  ;;  %v1098_v55 = vsel %vm878_vm10, %v1097_v49, 0.0  ;;  %1314 = vbcast.lane.b32.xlu1 %v1312_v62, 256  ;;  %v1326_v6 = vrot.slane %v1308_v61, %v1896_v8  ;;  %v1333_v63 = vrot.slane %v1308_v61, %v1906_v11 }
 0x402   :  { %v827_v32 = vrot.slane %v826_v24, 1  ;;  %v1050_v35 = vmul.f32 %v1606_v25, %v821_v4  ;;  %v1137_v48 = vsel %vm453_vm7, %v821_v4, %v1136_v43  ;;  %v1069_v60 = vsel %vm451_vm6, %v1068_v47, %v1067_v39 }
 0x403   :  { %v1340_v2 = vrot.slane %v1308_v61, %v1918_v16  ;;  %v1347_v31 = vrot.slane %v1308_v61, %v1924_v18  ;;  %v1361_v33 = vrot.slane %v1308_v61, %v1935_v22 }
 0x404   :  { %v828_v41 = vadd.f32 %v827_v32, %v826_v24  ;;  %v1070_v34 = vrot.slane %v1050_v35, 2  ;;  %v1354_v32 = vrot.slane %v1308_v61, %v1931_v20 }
 0x406   :  { %v1138_v51 = vsel %vm455_vm8, %v828_v41, %v1137_v48  ;;  %v1051_v36 = vmul.f32 %v1606_v25, %v828_v41  ;;  %v1071_v45 = vsel %vm453_vm7, %v1070_v34, %v1069_v60  ;;  %v1319_v25 = vrot.slane %v1308_v61, %v1899_v9 }
 0x407   :  { %1683 = vmatmul.mubr.msk.f32.vlgmr.msra.gmra.mxu0 %vm103_vm1, %v1138_v51  ;;  %v2254_v46 = vsel %vm103_vm1, %v1138_v51, %v1572_v57  ;;  %v1609_v12 = vld [vmem:[#allocation2] ss:$0 sm:$0xff] }
 0x408   :  { %v1072_v53 = vrot.slane %v1051_v36, 1  ;;  %1321 = vbcast.lane.b32.xlu1 %v1319_v25, 256 }
 0x40a   :  { %v1073_v38 = vsel %vm455_vm8, %v1072_v53, %v1071_v45 }
 0x40b   :  { %v1075_v54 = vsel %vm103_vm1, %v1073_v38, 0.0 }
 0x40c   :  { %1076 = vadd.xlane.f32.xlu0 %v1075_v54  ;;  %1328 = vbcast.lane.b32.xlu1 %v1326_v6, 256 }
 0x410   :  { %1099 = vadd.xlane.f32.xlu0 %v1098_v55  ;;  %1335 = vbcast.lane.b32.xlu1 %v1333_v63, 256 }
 0x414   :  { %1342 = vbcast.lane.b32.xlu1 %v1340_v2, 256 }
 0x418   :  { %1349 = vbcast.lane.b32.xlu1 %v1347_v31, 256 }
 0x41c   :  { %1356 = vbcast.lane.b32.xlu1 %v1354_v32, 256 }
 0x420   :  { %1363 = vbcast.lane.b32.xlu1 %v1361_v33, 256 }
 0x426   :  { %v1277_v57 = vpop.f32.mrf.mxu1 }
 0x428   :  { %v1695_v59 = vpop.f32.mrf.mxu1  ;;  %v1088_v5 = vpop.xlane.xlu1 %1087 }
 0x473   :  { %v1315_v51 = vpop.permute.xlu1 %1314 }
 0x474   :  { %vm1365_vm12 = vcmp.eq.s32.totalorder %v1315_v51, %v1999_v23 }
 0x475   :  { %v1614_v54 = vsel %vm1365_vm12, 1.0, %v1748_v1 }
 0x47a   :  { %v1322_v36 = vpop.permute.xlu1 %1321 }
 0x47b   :  { %vm1366_vm13 = vcmp.eq.s32.totalorder %v1322_v36, %v1999_v23 }
 0x47c   :  { %v1615_v38 = vsel %vm1366_vm13, 1.0, %v1748_v1 }
 0x47e   :  { %v1329_v52 = vpop.permute.xlu1 %1328 }
 0x47f   :  { %vm1367_vm14 = vcmp.eq.s32.totalorder %v1329_v52, %v1999_v23 }
 0x480   :  { %v1616_v55 = vsel %vm1367_vm14, 1.0, %v1748_v1 }
 0x482   :  { %v1336_v42 = vpop.permute.xlu1 %1335 }
 0x483   :  { %vm1368_vm15 = vcmp.eq.s32.totalorder %v1336_v42, %v1999_v23 }
 0x484   :  { %v1617_v58 = vsel %vm1368_vm15, 1.0, %v1748_v1 }
 0x486   :  { %v1343_v39 = vpop.permute.xlu1 %1342 }
 0x487   :  { %vm1369_vm0 = vcmp.eq.s32.totalorder %v1343_v39, %v1999_v23 }
 0x48a   :  { %v1350_v60 = vpop.permute.xlu1 %1349 }
 0x48b   :  { %vm1370_vm1 = vcmp.eq.s32.totalorder %v1350_v60, %v1999_v23 }
 0x48e   :  { %v1357_v53 = vpop.permute.xlu1 %1356 }
 0x48f   :  { %vm1371_vm9 = vcmp.eq.s32.totalorder %v1357_v53, %v1999_v23 }
 0x492   :  { %v2296_v45 = vpop.permute.xlu1 %1363 }
 0x493   :  { %vm1372_vm10 = vcmp.eq.s32.totalorder %v2296_v45, %v1999_v23 }
 0x495   :  { %v1077_v3 = vpop.xlane.xlu0 %1076 }
 0x496   :  { %v1089_v13 = vadd.f32 %v1088_v5, %v1077_v3  ;;  %v1618_v3 = vsel %vm1369_vm0, 1.0, %v1748_v1 }
 0x499   :  { %v1100_v10 = vpop.xlane.xlu0 %1099 }
 0x49a   :  { %v1101_v14 = vadd.f32 %v1100_v10, %v1089_v13 }
 0x49c   :  { %v1109_v15 = vadd.f32 %v1609_v12, %v1101_v14 }
 0x49e   :  { %v1610_v17 = vmul.f32 -1.442695, %v1109_v15  ;;  %v1619_v15 = vsel %vm1370_vm1, 1.0, %v1748_v1 }
 0x4a0   :  { %1739 = vpow2.f32 %v1610_v17 }
 0x4ad   :  { %v1740_v26 = vpop.eup %1739 }
 0x4ae   :  { %v1113_v29 = vadd.f32 1.0, %v1740_v26 }
 0x4b0   :  { %1741 = vrcp.f32 %v1113_v29 }
 0x4bd   :  { %v1742_v0 = vpop.eup %1741 }
 0x4be   :  { %v1301_v35 = vsub.f32 1.0, %v1742_v0 }
 0x4c7   :  { %v1207_v19 = vpop.f32.mrf.mxu0 }
 0x4c8   :  { %v1278_v4 = vadd.f32 %v1277_v57, %v1207_v19 }
 0x4c9   :  { %v1684_v24 = vpop.f32.mrf.mxu0 }
 0x4ca   :  { %v1288_v27 = vadd.f32 %v1613_v21, %v1278_v4  ;;  %v1620_v21 = vsel %vm1371_vm9, 1.0, %v1748_v1 }
 0x4cc   :  { %v1290_v28 = vsel %vm1289_vm11, %v1288_v27, -inf }
 0x4cd   :  { %1291 = vmax.xlane.f32.xlu0 %v1290_v28 }
 0x4e3   :  { %1304 = vperm.xlu0 %1704, %v1301_v35  }
 0x556   :  { %v1292_v37 = vpop.xlane.xlu0 %1291 }
 0x55e   :  { %v1305_v40 = vpop.permute.xlu0 %1304 }
 0x55f   :  { %v1307_v41 = vmul.f32 %v1305_v40, %v2228_v56 }
 0x561   :  { %v1399_v43 = vrot.slane %v1307_v41, %v1899_v9  ;;  %v1392_v44 = vrot.slane %v1307_v41, %v1893_v7  ;;  %v1406_v47 = vrot.slane %v1307_v41, %v1896_v8  ;;  %v1420_v48 = vrot.slane %v1307_v41, %v1918_v16 }
 0x562   :  { %v1413_v30 = vrot.slane %v1307_v41, %v1906_v11  ;;  %v1427_v50 = vrot.slane %v1307_v41, %v1924_v18  ;;  %v1434_v34 = vrot.slane %v1307_v41, %v1931_v20  ;;  %v1293_v9 = vsub.f32 %v1288_v27, %v1292_v37  ;;  %v1747_v18 = vld [vmem:[%s2369_s24] sm:$0xff]  ;;  %s1754_s24 = smov 49  }
 0x563   :  { %1401 = vbcast.lane.b32.xlu1 %v1399_v43, 256  ;;  %1394 = vbcast.lane.b32.xlu0 %v1392_v44, 256  ;;  %v1441_v11 = vrot.slane %v1307_v41, %v1935_v22  ;;  %v869_v20 = vadd.f32 %v1747_v18, %v2228_v56 }
 0x564   :  { %v1294_v7 = vmul.f32 1.442695, %v1293_v9 }
 0x566   :  { %1743 = vpow2.f32 %v1294_v7 }
 0x567   :  { %1408 = vbcast.lane.b32.xlu1 %v1406_v47, 256  ;;  %1422 = vbcast.lane.b32.xlu0 %v1420_v48, 256 }
 0x56b   :  { %1415 = vbcast.lane.b32.xlu1 %v1413_v30, 256  ;;  %1429 = vbcast.lane.b32.xlu0 %v1427_v50, 256 }
 0x56f   :  { %1436 = vbcast.lane.b32.xlu1 %v1434_v34, 256 }
 0x573   :  { %1511 = vperm.xlu1 %1703, %v1742_v0   ;;  %v2287_v8 = vpop.eup %1743 }
 0x574   :  { %v1296_v16 = vsel %vm1289_vm11, %v2287_v8, 0.0 }
 0x577   :  { %1578 = vrot.lane.b32.xlu1 %v1742_v0, %s1752_s21 }
 0x58a   :  { %1297 = vadd.xlane.f32.xlu0 %v1296_v16 }
 0x5a0   :  { %1443 = vbcast.lane.b32.xlu0 %v1441_v11, 256 }
 0x5a4   :  { %1575 = vrot.lane.b32.xlu0 %v869_v20, %s1753_s4 }
 0x5d5   :  { %v1402_v49 = vpop.permute.xlu1 %1401  ;;  %v1395_v56 = vpop.permute.xlu0 %1394 }
 0x5d6   :  { %v1446_v59 = vmul.f32 %v1615_v38, %v1402_v49  ;;  %v1445_v61 = vmul.f32 %v1614_v54, %v1395_v56  ;;  %v1621_v56 = vsel %vm1372_vm10, 1.0, %v1748_v1 }
 0x5d8   :  { %v1460_v63 = vsel %vm1289_vm11, %v1446_v59, 0.0  ;;  %v1453_v2 = vsel %vm1289_vm11, %v1445_v61, 0.0 }
 0x5d9   :  { %v1409_v22 = vpop.permute.xlu1 %1408  ;;  %v1423_v25 = vpop.permute.xlu0 %1422  ;;  %v1461_v13 = vrot.slane %v1460_v63, 4  ;;  %v1454_v14 = vrot.slane %v1453_v2, 4 }
 0x5da   :  { %v1447_v62 = vmul.f32 %v1616_v55, %v1409_v22  ;;  %v1449_v12 = vmul.f32 %v1618_v3, %v1423_v25 }
 0x5db   :  { %v1462_v27 = vadd.f32 %v1461_v13, %v1460_v63  ;;  %v1455_v28 = vadd.f32 %v1454_v14, %v1453_v2 }
 0x5dc   :  { %v1467_v5 = vsel %vm1289_vm11, %v1447_v62, 0.0  ;;  %v1481_v29 = vsel %vm1289_vm11, %v1449_v12, 0.0 }
 0x5dd   :  { %v1416_v57 = vpop.permute.xlu1 %1415  ;;  %v1430_v17 = vpop.permute.xlu0 %1429  ;;  %v1468_v19 = vrot.slane %v1467_v5, 4  ;;  %v1482_v33 = vrot.slane %v1481_v29, 4  ;;  %v1463_v37 = vrot.slane %v1462_v27, 2  ;;  %v1456_v40 = vrot.slane %v1455_v28, 2 }
 0x5de   :  { %v1448_v6 = vmul.f32 %v1617_v58, %v1416_v57  ;;  %v1450_v26 = vmul.f32 %v1619_v15, %v1430_v17 }
 0x5df   :  { %v1469_v32 = vadd.f32 %v1468_v19, %v1467_v5  ;;  %v1483_v48 = vadd.f32 %v1482_v33, %v1481_v29  ;;  %v1464_v50 = vadd.f32 %v1463_v37, %v1462_v27  ;;  %v1457_v34 = vadd.f32 %v1456_v40, %v1455_v28 }
 0x5e0   :  { %v1474_v10 = vsel %vm1289_vm11, %v1448_v6, 0.0  ;;  %v1488_v35 = vsel %vm1289_vm11, %v1450_v26, 0.0 }
 0x5e1   :  { %v1437_v4 = vpop.permute.xlu1 %1436  ;;  %v1475_v24 = vrot.slane %v1474_v10, 4  ;;  %v1470_v43 = vrot.slane %v1469_v32, 2  ;;  %v1489_v47 = vrot.slane %v1488_v35, 4  ;;  %v1484_v11 = vrot.slane %v1483_v48, 2 }
 0x5e2   :  { %v1451_v31 = vmul.f32 %v1620_v21, %v1437_v4  ;;  %v1465_v20 = vrot.slane %v1464_v50, 1  ;;  %v1458_v51 = vrot.slane %v1457_v34, 1 }
 0x5e3   :  { %v1476_v0 = vadd.f32 %v1475_v24, %v1474_v10  ;;  %v1471_v9 = vadd.f32 %v1470_v43, %v1469_v32  ;;  %v1490_v16 = vadd.f32 %v1489_v47, %v1488_v35  ;;  %v1485_v60 = vadd.f32 %v1484_v11, %v1483_v48 }
 0x5e4   :  { %v1495_v41 = vsel %vm1289_vm11, %v1451_v31, 0.0  ;;  %v1466_v49 = vadd.f32 %v1465_v20, %v1464_v50  ;;  %v1459_v22 = vadd.f32 %v1458_v51, %v1457_v34 }
 0x5e5   :  { %v1477_v44 = vrot.slane %v1476_v0, 2  ;;  %v1496_v30 = vrot.slane %v1495_v41, 4  ;;  %v1472_v52 = vrot.slane %v1471_v9, 1  ;;  %v1491_v39 = vrot.slane %v1490_v16, 2 }
 0x5e6   :  { %v1486_v59 = vrot.slane %v1485_v60, 1  ;;  %v1523_v23 = vsel %vm443_vm2, %v1466_v49, %v1459_v22  ;;  %vm1586_vm2 = vcmask 326656  }
 0x5e7   :  { %v1478_v7 = vadd.f32 %v1477_v44, %v1476_v0  ;;  %v1497_v18 = vadd.f32 %v1496_v30, %v1495_v41  ;;  %v1473_v54 = vadd.f32 %v1472_v52, %v1471_v9  ;;  %v1492_v57 = vadd.f32 %v1491_v39, %v1490_v16 }
 0x5e8   :  { %v1487_v3 = vadd.f32 %v1486_v59, %v1485_v60 }
 0x5e9   :  { %v1479_v42 = vrot.slane %v1478_v7, 1  ;;  %v1498_v53 = vrot.slane %v1497_v18, 2  ;;  %v1524_v25 = vsel %vm445_vm3, %v1473_v54, %v1523_v23  ;;  %v1493_v63 = vrot.slane %v1492_v57, 1 }
 0x5ea   :  { %vm1588_vm3 = vcmask 392192  }
 0x5eb   :  { %v1480_v58 = vadd.f32 %v1479_v42, %v1478_v7  ;;  %v1499_v61 = vadd.f32 %v1498_v53, %v1497_v18  ;;  %v1494_v14 = vadd.f32 %v1493_v63, %v1492_v57 }
 0x5ed   :  { %v1525_v6 = vsel %vm447_vm4, %v1480_v58, %v1524_v25  ;;  %v1500_v1 = vrot.slane %v1499_v61, 1  ;;  %vm1590_vm4 = vcmask 400384  }
 0x5ee   :  { %v1526_v10 = vsel %vm449_vm5, %v1487_v3, %v1525_v6  ;;  %v1512_v4 = vpop.permute.xlu1 %1511  ;;  %vm1592_vm5 = vcmask 695296  }
 0x5ef   :  { %v1501_v15 = vadd.f32 %v1500_v1, %v1499_v61  ;;  %v1527_v21 = vsel %vm451_vm6, %v1494_v14, %v1526_v10 }
 0x5f1   :  { %v1528_v27 = vsel %vm453_vm7, %v1501_v15, %v1527_v21 }
 0x613   :  { %v1298_v36 = vpop.xlane.xlu0 %1297 }
 0x614   :  { %1745 = vrcp.f32 %v1298_v36 }
 0x617   :  { %v1444_v38 = vpop.permute.xlu0 %1443 }
 0x618   :  { %v1452_v55 = vmul.f32 %v1621_v56, %v1444_v38 }
 0x61a   :  { %v1502_v62 = vsel %vm1289_vm11, %v1452_v55, 0.0 }
 0x61b   :  { %v1503_v45 = vrot.slane %v1502_v62, 4  ;;  %v1576_v31 = vpop.permute.xlu0 %1575 }
 0x61c   :  { %v1587_v32 = vsel %vm1586_vm2, %v2254_v46, %v1576_v31 }
 0x61d   :  { %v1504_v2 = vadd.f32 %v1503_v45, %v1502_v62 }
 0x61f   :  { %v1505_v5 = vrot.slane %v1504_v2, 2 }
 0x621   :  { %v1746_v13 = vpop.eup %1745  ;;  %v1506_v12 = vadd.f32 %v1505_v5, %v1504_v2 }
 0x622   :  { %v1300_v17 = vmul.f32 %v1746_v13, %v2287_v8  ;;  %v1579_v8 = vpop.permute.xlu1 %1578 }
 0x623   :  { %v1507_v19 = vrot.slane %v1506_v12, 1  ;;  %v1589_v0 = vsel %vm1588_vm3, %v1587_v32, %v1579_v8 }
 0x624   :  { %v1514_v26 = vmul.f32 %v1512_v4, %v1300_v17 }
 0x625   :  { %v1508_v24 = vadd.f32 %v1507_v19, %v1506_v12 }
 0x627   :  { %v1529_v28 = vsel %vm455_vm8, %v1508_v24, %v1528_v27 }
 0x628   :  { %v1531_v29 = vadd.f32 %v1529_v28, %v1514_v26 }
 0x62a   :  { %1582 = vrot.lane.b32.xlu0 %v1531_v29, %s1754_s24 }
 0x69c   :  { %v1583_v33 = vpop.permute.xlu0 %1582 }
 0x69d   :  { %v1591_v35 = vsel %vm1590_vm4, %v1589_v0, %v1583_v33 }
 0x69e   :  { %v1593_v37 = vsel %vm1592_vm5, %v1591_v35, 0.0 }
 0x69f   :  { %1594 = vst [vmem:[%s2357_s22] sm:$0xff] %v1593_v37 }

</bundles_post_ra>
